<compile_context>
chip_gen: v6e
topology: v6e:2x2x1
jax: 0.10.0
libtpu: 0.0.40
codegen_flags: <defaults>
</compile_context>

<pallas_src>
import math

import jax
import jax.numpy as jnp
from jax import lax
from jax.experimental import pallas as pl
from jax.experimental.pallas import tpu as pltpu

TRG_EOS_IDX = 3
TRG_PAD_IDX = 4

# Small model dims consistent with the GBERT G2P decoder.
HID_DIM = 32
N_HEADS = 4
HEAD_DIM = HID_DIM // N_HEADS
PF_DIM = 64
OUTPUT_DIM = 16          # target (phoneme) vocab size
MAX_LEN = 80
VOCAB_PAD = 128          # lane-dense padded width for the final projection
NEG_INF = -1e10


# ---------------- the single fused Pallas kernel ----------------

def _decoder_layer_kernel(
    x_ref, enc_ref, tmask_ref, smask_ref,
    s_wqkv_ref, s_bqkv_ref, s_wo_ref, s_bo_ref, ln1g_ref, ln1b_ref,
    c_wq_ref, c_bq_ref, c_wkv_ref, c_bkv_ref, c_wo_ref, c_bo_ref, ln2g_ref, ln2b_ref,
    f1w_ref, f1b_ref, f2w_ref, f2b_ref, ln3g_ref, ln3b_ref,
    ow_ref, ob_ref,
    logits_ref, attn_ref,
    buf_ref,
):
    BT, H = x_ref.shape
    T = tmask_ref.shape[1]
    B = BT // T
    S = smask_ref.shape[1]
    NH = N_HEADS
    HD = H // NH
    scale = 1.0 / math.sqrt(HD)

    def layernorm(y, g, b):
        mean = jnp.mean(y, axis=-1, keepdims=True)
        var = jnp.mean(jnp.square(y - mean), axis=-1, keepdims=True)
        return (y - mean) * lax.rsqrt(var + 1e-5) * g + b

    def softmax_rows(sc):
        smax = jnp.max(sc, axis=-1, keepdims=True)
        p = jnp.exp(sc - smax)
        return p / jnp.sum(p, axis=-1, keepdims=True)

    x = x_ref[...]          # [B*T, H]  lane-dense activations
    enc = enc_ref[...]      # [B*S, H]  encoder memory

    # ----- masked self-attention (fused QKV, heads = static lane slices) -----
    qkv = jnp.dot(x, s_wqkv_ref[...], preferred_element_type=jnp.float32) + s_bqkv_ref[...]
    for b in range(B):
        mb = tmask_ref[b * T:(b + 1) * T, :]                       # [T, T] additive mask
        for h in range(NH):
            qh = qkv[b * T:(b + 1) * T, h * HD:(h + 1) * HD]
            kh = qkv[b * T:(b + 1) * T, H + h * HD:H + (h + 1) * HD]
            vh = qkv[b * T:(b + 1) * T, 2 * H + h * HD:2 * H + (h + 1) * HD]
            sc = lax.dot_general(qh, kh, (((1,), (1,)), ((), ())),
                                 preferred_element_type=jnp.float32) * scale + mb
            p = softmax_rows(sc)
            buf_ref[b * T:(b + 1) * T, h * HD:(h + 1) * HD] = jnp.dot(
                p, vh, preferred_element_type=jnp.float32)
    sa = jnp.dot(buf_ref[...], s_wo_ref[...], preferred_element_type=jnp.float32) + s_bo_ref[...]
    x = layernorm(x + sa, ln1g_ref[...], ln1b_ref[...])

    # ----- cross-attention over encoder memory (fused KV projection) -----
    cq = jnp.dot(x, c_wq_ref[...], preferred_element_type=jnp.float32) + c_bq_ref[...]
    ckv = jnp.dot(enc, c_wkv_ref[...], preferred_element_type=jnp.float32) + c_bkv_ref[...]
    for b in range(B):
        smb = smask_ref[b:b + 1, :]                                # [1, S] additive mask
        for h in range(NH):
            qh = cq[b * T:(b + 1) * T, h * HD:(h + 1) * HD]
            kh = ckv[b * S:(b + 1) * S, h * HD:(h + 1) * HD]
            vh = ckv[b * S:(b + 1) * S, H + h * HD:H + (h + 1) * HD]
            sc = lax.dot_general(qh, kh, (((1,), (1,)), ((), ())),
                                 preferred_element_type=jnp.float32) * scale + smb
            p = softmax_rows(sc)
            attn_ref[(b * NH + h) * T:(b * NH + h + 1) * T, :] = p
            buf_ref[b * T:(b + 1) * T, h * HD:(h + 1) * HD] = jnp.dot(
                p, vh, preferred_element_type=jnp.float32)
    ca = jnp.dot(buf_ref[...], c_wo_ref[...], preferred_element_type=jnp.float32) + c_bo_ref[...]
    x = layernorm(x + ca, ln2g_ref[...], ln2b_ref[...])

    # ----- position-wise feed-forward -----
    hdn = jnp.maximum(
        jnp.dot(x, f1w_ref[...], preferred_element_type=jnp.float32) + f1b_ref[...], 0.0)
    ff = jnp.dot(hdn, f2w_ref[...], preferred_element_type=jnp.float32) + f2b_ref[...]
    x = layernorm(x + ff, ln3g_ref[...], ln3b_ref[...])

    # ----- final vocab projection into a lane-dense 128-wide slab -----
    logits_ref[...] = jnp.dot(x, ow_ref[...], preferred_element_type=jnp.float32) + ob_ref[...]


# ---------------- decoder + Seq2Seq forward (thin glue in plain JAX) ----------------

def decoder_forward(fp, trg, enc_src, trg_mask, src_mask):
    B, T = trg.shape
    S = enc_src.shape[1]
    emb_scale = jnp.sqrt(jnp.float32(HID_DIM))
    tok = fp['tok_emb'][trg]                       # [B, T, H]  (gather stays in XLA)
    pos = fp['pos_emb'][:T][None]                  # [1, T, H]
    x = (tok * emb_scale + pos).reshape(B * T, HID_DIM)   # dropout omitted (eval)

    # additive masks: 0.0 = attend, -1e10 = masked (matches masked_fill(-1e10)+softmax)
    tmask = jnp.where(trg_mask[:, 0], 0.0, NEG_INF).astype(jnp.float32).reshape(B * T, T)
    smask = jnp.where(src_mask.reshape(B, S), 0.0, NEG_INF).astype(jnp.float32)

    logits_pad, attn_flat = pl.pallas_call(
        _decoder_layer_kernel,
        out_shape=(
            jax.ShapeDtypeStruct((B * T, VOCAB_PAD), jnp.float32),
            jax.ShapeDtypeStruct((B * N_HEADS * T, S), jnp.float32),
        ),
        scratch_shapes=[pltpu.VMEM((B * T, HID_DIM), jnp.float32)],
    )(x, enc_src.reshape(B * S, HID_DIM), tmask, smask,
      fp['s_wqkv'], fp['s_bqkv'], fp['s_wo'], fp['s_bo'], fp['ln1_g'], fp['ln1_b'],
      fp['c_wq'], fp['c_bq'], fp['c_wkv'], fp['c_bkv'], fp['c_wo'], fp['c_bo'],
      fp['ln2_g'], fp['ln2_b'],
      fp['fc1_w'], fp['fc1_b'], fp['fc2_w'], fp['fc2_b'], fp['ln3_g'], fp['ln3_b'],
      fp['out_w'], fp['out_b'])

    logits = logits_pad[:, :OUTPUT_DIM].reshape(B, T, OUTPUT_DIM)
    attention = attn_flat.reshape(B, N_HEADS, T, S)
    return logits, attention


def make_trg_mask(trg, trg_pad_idx):
    _, T = trg.shape
    pad_mask = (trg != trg_pad_idx)[:, None, :, None]      # [B, 1, T, 1]
    sub_mask = jnp.tril(jnp.ones((T, T), dtype=bool))      # [T, T]
    return pad_mask & sub_mask                              # [B, 1, T, T]


def seq2seq_forward(fused_params, src_pretrain_hidden, src_mask, trg):
    """Teacher-forcing (teacher_forcing_ratio == 1) path of Seq2Seq.forward."""
    trg_mask = make_trg_mask(trg, TRG_PAD_IDX)
    outputs, attention = decoder_forward(fused_params, trg, src_pretrain_hidden,
                                         trg_mask, src_mask)
    argmax_outputs = jnp.argmax(outputs, axis=2)
    return outputs, argmax_outputs, None
# TODO(synk): the teacher_forcing_ratio != 1 greedy decode loop and forward_beam
# beam search use data-dependent Python control flow with early exits; only the
# teacher-forcing path is implemented here. Dropout is omitted (eval-only path).


# ---------------- parameter init + one-time fusion/padding prep ----------------

def init_params(key):
    keys = iter(jax.random.split(key, 32))

    def w(shape, scale=0.02):
        return jax.random.normal(next(keys), shape, jnp.float32) * scale

    p = {'tok_emb': w((OUTPUT_DIM, HID_DIM)),
         'pos_emb': w((MAX_LEN, HID_DIM))}
    for pre in ('self', 'cross'):
        for n in ('q', 'k', 'v', 'o'):
            p[f'{pre}_w{n}'] = w((HID_DIM, HID_DIM))
            p[f'{pre}_b{n}'] = jnp.zeros((HID_DIM,), jnp.float32)
    p['fc1_w'] = w((HID_DIM, PF_DIM)); p['fc1_b'] = jnp.zeros((PF_DIM,), jnp.float32)
    p['fc2_w'] = w((PF_DIM, HID_DIM)); p['fc2_b'] = jnp.zeros((HID_DIM,), jnp.float32)
    p['out_w'] = w((HID_DIM, OUTPUT_DIM)); p['out_b'] = jnp.zeros((OUTPUT_DIM,), jnp.float32)
    for n in ('1', '2', '3'):
        p[f'ln{n}_g'] = jnp.ones((HID_DIM,), jnp.float32)
        p[f'ln{n}_b'] = jnp.zeros((HID_DIM,), jnp.float32)
    return p


def prepare_fused_params(p):
    """One-time prep: fuse QKV / KV weights, pad vocab projection to 128 lanes."""
    f = {'tok_emb': p['tok_emb'], 'pos_emb': p['pos_emb']}
    f['s_wqkv'] = jnp.concatenate([p['self_wq'], p['self_wk'], p['self_wv']], axis=1)
    f['s_bqkv'] = jnp.concatenate([p['self_bq'], p['self_bk'], p['self_bv']]).reshape(1, -1)
    f['s_wo'] = p['self_wo']; f['s_bo'] = p['self_bo'].reshape(1, -1)
    f['c_wq'] = p['cross_wq']; f['c_bq'] = p['cross_bq'].reshape(1, -1)
    f['c_wkv'] = jnp.concatenate([p['cross_wk'], p['cross_wv']], axis=1)
    f['c_bkv'] = jnp.concatenate([p['cross_bk'], p['cross_bv']]).reshape(1, -1)
    f['c_wo'] = p['cross_wo']; f['c_bo'] = p['cross_bo'].reshape(1, -1)
    f['fc1_w'] = p['fc1_w']; f['fc1_b'] = p['fc1_b'].reshape(1, -1)
    f['fc2_w'] = p['fc2_w']; f['fc2_b'] = p['fc2_b'].reshape(1, -1)
    for n in ('1', '2', '3'):
        f[f'ln{n}_g'] = p[f'ln{n}_g'].reshape(1, -1)
        f[f'ln{n}_b'] = p[f'ln{n}_b'].reshape(1, -1)
    f['out_w'] = jnp.zeros((HID_DIM, VOCAB_PAD), jnp.float32).at[:, :OUTPUT_DIM].set(p['out_w'])
    f['out_b'] = jnp.zeros((1, VOCAB_PAD), jnp.float32).at[0, :OUTPUT_DIM].set(p['out_b'])
    return f


if __name__ == "__main__":
    key = jax.random.PRNGKey(0)
    k_p, k_enc, k_trg = jax.random.split(key, 3)
    params = init_params(k_p)
    fused = prepare_fused_params(params)

    B, T, S = 2, 8, 8
    src_pretrain_hidden = jax.random.normal(k_enc, (B, S, HID_DIM), jnp.float32)
    trg = jax.random.randint(k_trg, (B, T), 0, OUTPUT_DIM).astype(jnp.int32)
    trg = trg.at[:, 0].set(2)                       # SOS token
    src_mask = jnp.ones((B, 1, 1, S), dtype=bool)   # all source positions valid

    outputs, argmax_outputs, _ = jax.jit(seq2seq_forward)(
        fused, src_pretrain_hidden, src_mask, trg)
    jax.block_until_ready((outputs, argmax_outputs))

    assert outputs.shape == (B, T, OUTPUT_DIM)
    assert outputs.dtype == jnp.float32
    assert argmax_outputs.shape == (B, T)
    print("KERNEL_OK")
</pallas_src>

<mosaic_0001>
module attributes {stable_mosaic.version = 11 : i64} {
  func.func @_decoder_layer_kernel(%arg0: memref<16x32xf32, #tpu.memory_space<vmem>>, %arg1: memref<16x32xf32, #tpu.memory_space<vmem>>, %arg2: memref<16x8xf32, #tpu.memory_space<vmem>>, %arg3: memref<2x8xf32, #tpu.memory_space<vmem>>, %arg4: memref<32x96xf32, #tpu.memory_space<vmem>>, %arg5: memref<1x96xf32, #tpu.memory_space<vmem>>, %arg6: memref<32x32xf32, #tpu.memory_space<vmem>>, %arg7: memref<1x32xf32, #tpu.memory_space<vmem>>, %arg8: memref<1x32xf32, #tpu.memory_space<vmem>>, %arg9: memref<1x32xf32, #tpu.memory_space<vmem>>, %arg10: memref<32x32xf32, #tpu.memory_space<vmem>>, %arg11: memref<1x32xf32, #tpu.memory_space<vmem>>, %arg12: memref<32x64xf32, #tpu.memory_space<vmem>>, %arg13: memref<1x64xf32, #tpu.memory_space<vmem>>, %arg14: memref<32x32xf32, #tpu.memory_space<vmem>>, %arg15: memref<1x32xf32, #tpu.memory_space<vmem>>, %arg16: memref<1x32xf32, #tpu.memory_space<vmem>>, %arg17: memref<1x32xf32, #tpu.memory_space<vmem>>, %arg18: memref<32x64xf32, #tpu.memory_space<vmem>>, %arg19: memref<1x64xf32, #tpu.memory_space<vmem>>, %arg20: memref<64x32xf32, #tpu.memory_space<vmem>>, %arg21: memref<1x32xf32, #tpu.memory_space<vmem>>, %arg22: memref<1x32xf32, #tpu.memory_space<vmem>>, %arg23: memref<1x32xf32, #tpu.memory_space<vmem>>, %arg24: memref<32x128xf32, #tpu.memory_space<vmem>>, %arg25: memref<1x128xf32, #tpu.memory_space<vmem>>, %arg26: memref<16x128xf32, #tpu.memory_space<vmem>>, %arg27: memref<64x8xf32, #tpu.memory_space<vmem>>, %arg28: memref<16x32xf32, #tpu.memory_space<vmem>>) attributes {dimension_semantics = [], scalar_prefetch = 0 : i64, scratch_operands = 1 : i64, tpu.core_type = #tpu.core_type<tc>} {
    %c0 = arith.constant 0 : index
    %c0_0 = arith.constant 0 : index
    %0 = vector.load %arg0[%c0, %c0_0] : memref<16x32xf32, #tpu.memory_space<vmem>>, vector<16x32xf32>
    %c0_1 = arith.constant 0 : index
    %c0_2 = arith.constant 0 : index
    %1 = vector.load %arg1[%c0_1, %c0_2] : memref<16x32xf32, #tpu.memory_space<vmem>>, vector<16x32xf32>
    %c0_3 = arith.constant 0 : index
    %c0_4 = arith.constant 0 : index
    %2 = vector.load %arg4[%c0_3, %c0_4] : memref<32x96xf32, #tpu.memory_space<vmem>>, vector<32x96xf32>
    %cst = arith.constant dense<0.000000e+00> : vector<16x96xf32>
    %3 = tpu.matmul %0, %2, %cst {dimension_numbers = #tpu.dot_dimension_numbers<[1], [0], [0], [1], [0, 0, 1, 1], [], []>} : vector<16x32xf32>, vector<32x96xf32>, vector<16x96xf32> -> vector<16x96xf32>
    %c0_5 = arith.constant 0 : index
    %c0_6 = arith.constant 0 : index
    %4 = vector.load %arg5[%c0_5, %c0_6] : memref<1x96xf32, #tpu.memory_space<vmem>>, vector<1x96xf32>
    %5 = vector.broadcast %4 : vector<1x96xf32> to vector<16x96xf32>
    %6 = arith.addf %3, %5 : vector<16x96xf32>
    %c0_7 = arith.constant 0 : index
    %c0_8 = arith.constant 0 : index
    %7 = vector.load %arg2[%c0_7, %c0_8] : memref<16x8xf32, #tpu.memory_space<vmem>>, vector<8x8xf32>
    %8 = vector.extract_strided_slice %6 {offsets = [0, 0], sizes = [8, 8], strides = [1, 1]} : vector<16x96xf32> to vector<8x8xf32>
    %9 = vector.extract_strided_slice %6 {offsets = [0, 32], sizes = [8, 8], strides = [1, 1]} : vector<16x96xf32> to vector<8x8xf32>
    %10 = vector.extract_strided_slice %6 {offsets = [0, 64], sizes = [8, 8], strides = [1, 1]} : vector<16x96xf32> to vector<8x8xf32>
    %cst_9 = arith.constant dense<0.000000e+00> : vector<8x8xf32>
    %11 = tpu.matmul %8, %9, %cst_9 {dimension_numbers = #tpu.dot_dimension_numbers<[1], [1], [0], [0], [0, 0, 1, 0], [], []>} : vector<8x8xf32>, vector<8x8xf32>, vector<8x8xf32> -> vector<8x8xf32>
    %cst_10 = arith.constant 0.353553385 : f32
    %12 = vector.broadcast %cst_10 : f32 to vector<8x8xf32>
    %13 = arith.mulf %11, %12 : vector<8x8xf32>
    %14 = arith.addf %13, %7 : vector<8x8xf32>
    %cst_11 = arith.constant dense<0xFF800000> : vector<8xf32>
    %15 = vector.multi_reduction <maximumf>, %14, %cst_11 [1] : vector<8x8xf32> to vector<8xf32>
    %16 = vector.shape_cast %15 : vector<8xf32> to vector<8x1xf32>
    %17 = vector.broadcast %16 : vector<8x1xf32> to vector<8x8xf32>
    %18 = arith.subf %14, %17 : vector<8x8xf32>
    %19 = math.exp %18 : vector<8x8xf32>
    %cst_12 = arith.constant dense<0.000000e+00> : vector<8xf32>
    %20 = vector.multi_reduction <add>, %19, %cst_12 [1] : vector<8x8xf32> to vector<8xf32>
    %21 = vector.shape_cast %20 : vector<8xf32> to vector<8x1xf32>
    %22 = vector.broadcast %21 : vector<8x1xf32> to vector<8x8xf32>
    %23 = arith.divf %19, %22 : vector<8x8xf32>
    %cst_13 = arith.constant dense<0.000000e+00> : vector<8x8xf32>
    %24 = tpu.matmul %23, %10, %cst_13 {dimension_numbers = #tpu.dot_dimension_numbers<[1], [0], [0], [1], [0, 0, 1, 1], [], []>} : vector<8x8xf32>, vector<8x8xf32>, vector<8x8xf32> -> vector<8x8xf32>
    %c0_14 = arith.constant 0 : index
    %c0_15 = arith.constant 0 : index
    %25 = vector.load %arg28[%c0_14, %c0_15] : memref<16x32xf32, #tpu.memory_space<vmem>>, vector<8x8xf32>
    tpu.vector_store %arg28[%c0_14, %c0_15], %24 {strides = array<i32>} : memref<16x32xf32, #tpu.memory_space<vmem>>, vector<8x8xf32>,
    %26 = vector.extract_strided_slice %6 {offsets = [0, 8], sizes = [8, 8], strides = [1, 1]} : vector<16x96xf32> to vector<8x8xf32>
    %27 = vector.extract_strided_slice %6 {offsets = [0, 40], sizes = [8, 8], strides = [1, 1]} : vector<16x96xf32> to vector<8x8xf32>
    %28 = vector.extract_strided_slice %6 {offsets = [0, 72], sizes = [8, 8], strides = [1, 1]} : vector<16x96xf32> to vector<8x8xf32>
    %cst_16 = arith.constant dense<0.000000e+00> : vector<8x8xf32>
    %29 = tpu.matmul %26, %27, %cst_16 {dimension_numbers = #tpu.dot_dimension_numbers<[1], [1], [0], [0], [0, 0, 1, 0], [], []>} : vector<8x8xf32>, vector<8x8xf32>, vector<8x8xf32> -> vector<8x8xf32>
    %cst_17 = arith.constant 0.353553385 : f32
    %30 = vector.broadcast %cst_17 : f32 to vector<8x8xf32>
    %31 = arith.mulf %29, %30 : vector<8x8xf32>
    %32 = arith.addf %31, %7 : vector<8x8xf32>
    %cst_18 = arith.constant dense<0xFF800000> : vector<8xf32>
    %33 = vector.multi_reduction <maximumf>, %32, %cst_18 [1] : vector<8x8xf32> to vector<8xf32>
    %34 = vector.shape_cast %33 : vector<8xf32> to vector<8x1xf32>
    %35 = vector.broadcast %34 : vector<8x1xf32> to vector<8x8xf32>
    %36 = arith.subf %32, %35 : vector<8x8xf32>
    %37 = math.exp %36 : vector<8x8xf32>
    %cst_19 = arith.constant dense<0.000000e+00> : vector<8xf32>
    %38 = vector.multi_reduction <add>, %37, %cst_19 [1] : vector<8x8xf32> to vector<8xf32>
    %39 = vector.shape_cast %38 : vector<8xf32> to vector<8x1xf32>
    %40 = vector.broadcast %39 : vector<8x1xf32> to vector<8x8xf32>
    %41 = arith.divf %37, %40 : vector<8x8xf32>
    %cst_20 = arith.constant dense<0.000000e+00> : vector<8x8xf32>
    %42 = tpu.matmul %41, %28, %cst_20 {dimension_numbers = #tpu.dot_dimension_numbers<[1], [0], [0], [1], [0, 0, 1, 1], [], []>} : vector<8x8xf32>, vector<8x8xf32>, vector<8x8xf32> -> vector<8x8xf32>
    %c0_21 = arith.constant 0 : index
    %c8 = arith.constant 8 : index
    %43 = vector.load %arg28[%c0_21, %c8] : memref<16x32xf32, #tpu.memory_space<vmem>>, vector<8x8xf32>
    tpu.vector_store %arg28[%c0_21, %c8], %42 {strides = array<i32>} : memref<16x32xf32, #tpu.memory_space<vmem>>, vector<8x8xf32>,
    %44 = vector.extract_strided_slice %6 {offsets = [0, 16], sizes = [8, 8], strides = [1, 1]} : vector<16x96xf32> to vector<8x8xf32>
    %45 = vector.extract_strided_slice %6 {offsets = [0, 48], sizes = [8, 8], strides = [1, 1]} : vector<16x96xf32> to vector<8x8xf32>
    %46 = vector.extract_strided_slice %6 {offsets = [0, 80], sizes = [8, 8], strides = [1, 1]} : vector<16x96xf32> to vector<8x8xf32>
    %cst_22 = arith.constant dense<0.000000e+00> : vector<8x8xf32>
    %47 = tpu.matmul %44, %45, %cst_22 {dimension_numbers = #tpu.dot_dimension_numbers<[1], [1], [0], [0], [0, 0, 1, 0], [], []>} : vector<8x8xf32>, vector<8x8xf32>, vector<8x8xf32> -> vector<8x8xf32>
    %cst_23 = arith.constant 0.353553385 : f32
    %48 = vector.broadcast %cst_23 : f32 to vector<8x8xf32>
    %49 = arith.mulf %47, %48 : vector<8x8xf32>
    %50 = arith.addf %49, %7 : vector<8x8xf32>
    %cst_24 = arith.constant dense<0xFF800000> : vector<8xf32>
    %51 = vector.multi_reduction <maximumf>, %50, %cst_24 [1] : vector<8x8xf32> to vector<8xf32>
    %52 = vector.shape_cast %51 : vector<8xf32> to vector<8x1xf32>
    %53 = vector.broadcast %52 : vector<8x1xf32> to vector<8x8xf32>
    %54 = arith.subf %50, %53 : vector<8x8xf32>
    %55 = math.exp %54 : vector<8x8xf32>
    %cst_25 = arith.constant dense<0.000000e+00> : vector<8xf32>
    %56 = vector.multi_reduction <add>, %55, %cst_25 [1] : vector<8x8xf32> to vector<8xf32>
    %57 = vector.shape_cast %56 : vector<8xf32> to vector<8x1xf32>
    %58 = vector.broadcast %57 : vector<8x1xf32> to vector<8x8xf32>
    %59 = arith.divf %55, %58 : vector<8x8xf32>
    %cst_26 = arith.constant dense<0.000000e+00> : vector<8x8xf32>
    %60 = tpu.matmul %59, %46, %cst_26 {dimension_numbers = #tpu.dot_dimension_numbers<[1], [0], [0], [1], [0, 0, 1, 1], [], []>} : vector<8x8xf32>, vector<8x8xf32>, vector<8x8xf32> -> vector<8x8xf32>
    %c0_27 = arith.constant 0 : index
    %c16 = arith.constant 16 : index
    %61 = vector.load %arg28[%c0_27, %c16] : memref<16x32xf32, #tpu.memory_space<vmem>>, vector<8x8xf32>
    tpu.vector_store %arg28[%c0_27, %c16], %60 {strides = array<i32>} : memref<16x32xf32, #tpu.memory_space<vmem>>, vector<8x8xf32>,
    %62 = vector.extract_strided_slice %6 {offsets = [0, 24], sizes = [8, 8], strides = [1, 1]} : vector<16x96xf32> to vector<8x8xf32>
    %63 = vector.extract_strided_slice %6 {offsets = [0, 56], sizes = [8, 8], strides = [1, 1]} : vector<16x96xf32> to vector<8x8xf32>
    %64 = vector.extract_strided_slice %6 {offsets = [0, 88], sizes = [8, 8], strides = [1, 1]} : vector<16x96xf32> to vector<8x8xf32>
    %cst_28 = arith.constant dense<0.000000e+00> : vector<8x8xf32>
    %65 = tpu.matmul %62, %63, %cst_28 {dimension_numbers = #tpu.dot_dimension_numbers<[1], [1], [0], [0], [0, 0, 1, 0], [], []>} : vector<8x8xf32>, vector<8x8xf32>, vector<8x8xf32> -> vector<8x8xf32>
    %cst_29 = arith.constant 0.353553385 : f32
    %66 = vector.broadcast %cst_29 : f32 to vector<8x8xf32>
    %67 = arith.mulf %65, %66 : vector<8x8xf32>
    %68 = arith.addf %67, %7 : vector<8x8xf32>
    %cst_30 = arith.constant dense<0xFF800000> : vector<8xf32>
    %69 = vector.multi_reduction <maximumf>, %68, %cst_30 [1] : vector<8x8xf32> to vector<8xf32>
    %70 = vector.shape_cast %69 : vector<8xf32> to vector<8x1xf32>
    %71 = vector.broadcast %70 : vector<8x1xf32> to vector<8x8xf32>
    %72 = arith.subf %68, %71 : vector<8x8xf32>
    %73 = math.exp %72 : vector<8x8xf32>
    %cst_31 = arith.constant dense<0.000000e+00> : vector<8xf32>
    %74 = vector.multi_reduction <add>, %73, %cst_31 [1] : vector<8x8xf32> to vector<8xf32>
    %75 = vector.shape_cast %74 : vector<8xf32> to vector<8x1xf32>
    %76 = vector.broadcast %75 : vector<8x1xf32> to vector<8x8xf32>
    %77 = arith.divf %73, %76 : vector<8x8xf32>
    %cst_32 = arith.constant dense<0.000000e+00> : vector<8x8xf32>
    %78 = tpu.matmul %77, %64, %cst_32 {dimension_numbers = #tpu.dot_dimension_numbers<[1], [0], [0], [1], [0, 0, 1, 1], [], []>} : vector<8x8xf32>, vector<8x8xf32>, vector<8x8xf32> -> vector<8x8xf32>
    %c0_33 = arith.constant 0 : index
    %c24 = arith.constant 24 : index
    %79 = vector.load %arg28[%c0_33, %c24] : memref<16x32xf32, #tpu.memory_space<vmem>>, vector<8x8xf32>
    tpu.vector_store %arg28[%c0_33, %c24], %78 {strides = array<i32>} : memref<16x32xf32, #tpu.memory_space<vmem>>, vector<8x8xf32>,
    %c8_34 = arith.constant 8 : index
    %c0_35 = arith.constant 0 : index
    %80 = vector.load %arg2[%c8_34, %c0_35] : memref<16x8xf32, #tpu.memory_space<vmem>>, vector<8x8xf32>
    %81 = vector.extract_strided_slice %6 {offsets = [8, 0], sizes = [8, 8], strides = [1, 1]} : vector<16x96xf32> to vector<8x8xf32>
    %82 = vector.extract_strided_slice %6 {offsets = [8, 32], sizes = [8, 8], strides = [1, 1]} : vector<16x96xf32> to vector<8x8xf32>
    %83 = vector.extract_strided_slice %6 {offsets = [8, 64], sizes = [8, 8], strides = [1, 1]} : vector<16x96xf32> to vector<8x8xf32>
    %cst_36 = arith.constant dense<0.000000e+00> : vector<8x8xf32>
    %84 = tpu.matmul %81, %82, %cst_36 {dimension_numbers = #tpu.dot_dimension_numbers<[1], [1], [0], [0], [0, 0, 1, 0], [], []>} : vector<8x8xf32>, vector<8x8xf32>, vector<8x8xf32> -> vector<8x8xf32>
    %cst_37 = arith.constant 0.353553385 : f32
    %85 = vector.broadcast %cst_37 : f32 to vector<8x8xf32>
    %86 = arith.mulf %84, %85 : vector<8x8xf32>
    %87 = arith.addf %86, %80 : vector<8x8xf32>
    %cst_38 = arith.constant dense<0xFF800000> : vector<8xf32>
    %88 = vector.multi_reduction <maximumf>, %87, %cst_38 [1] : vector<8x8xf32> to vector<8xf32>
    %89 = vector.shape_cast %88 : vector<8xf32> to vector<8x1xf32>
    %90 = vector.broadcast %89 : vector<8x1xf32> to vector<8x8xf32>
    %91 = arith.subf %87, %90 : vector<8x8xf32>
    %92 = math.exp %91 : vector<8x8xf32>
    %cst_39 = arith.constant dense<0.000000e+00> : vector<8xf32>
    %93 = vector.multi_reduction <add>, %92, %cst_39 [1] : vector<8x8xf32> to vector<8xf32>
    %94 = vector.shape_cast %93 : vector<8xf32> to vector<8x1xf32>
    %95 = vector.broadcast %94 : vector<8x1xf32> to vector<8x8xf32>
    %96 = arith.divf %92, %95 : vector<8x8xf32>
    %cst_40 = arith.constant dense<0.000000e+00> : vector<8x8xf32>
    %97 = tpu.matmul %96, %83, %cst_40 {dimension_numbers = #tpu.dot_dimension_numbers<[1], [0], [0], [1], [0, 0, 1, 1], [], []>} : vector<8x8xf32>, vector<8x8xf32>, vector<8x8xf32> -> vector<8x8xf32>
    %c8_41 = arith.constant 8 : index
    %c0_42 = arith.constant 0 : index
    %98 = vector.load %arg28[%c8_41, %c0_42] : memref<16x32xf32, #tpu.memory_space<vmem>>, vector<8x8xf32>
    tpu.vector_store %arg28[%c8_41, %c0_42], %97 {strides = array<i32>} : memref<16x32xf32, #tpu.memory_space<vmem>>, vector<8x8xf32>,
    %99 = vector.extract_strided_slice %6 {offsets = [8, 8], sizes = [8, 8], strides = [1, 1]} : vector<16x96xf32> to vector<8x8xf32>
    %100 = vector.extract_strided_slice %6 {offsets = [8, 40], sizes = [8, 8], strides = [1, 1]} : vector<16x96xf32> to vector<8x8xf32>
    %101 = vector.extract_strided_slice %6 {offsets = [8, 72], sizes = [8, 8], strides = [1, 1]} : vector<16x96xf32> to vector<8x8xf32>
    %cst_43 = arith.constant dense<0.000000e+00> : vector<8x8xf32>
    %102 = tpu.matmul %99, %100, %cst_43 {dimension_numbers = #tpu.dot_dimension_numbers<[1], [1], [0], [0], [0, 0, 1, 0], [], []>} : vector<8x8xf32>, vector<8x8xf32>, vector<8x8xf32> -> vector<8x8xf32>
    %cst_44 = arith.constant 0.353553385 : f32
    %103 = vector.broadcast %cst_44 : f32 to vector<8x8xf32>
    %104 = arith.mulf %102, %103 : vector<8x8xf32>
    %105 = arith.addf %104, %80 : vector<8x8xf32>
    %cst_45 = arith.constant dense<0xFF800000> : vector<8xf32>
    %106 = vector.multi_reduction <maximumf>, %105, %cst_45 [1] : vector<8x8xf32> to vector<8xf32>
    %107 = vector.shape_cast %106 : vector<8xf32> to vector<8x1xf32>
    %108 = vector.broadcast %107 : vector<8x1xf32> to vector<8x8xf32>
    %109 = arith.subf %105, %108 : vector<8x8xf32>
    %110 = math.exp %109 : vector<8x8xf32>
    %cst_46 = arith.constant dense<0.000000e+00> : vector<8xf32>
    %111 = vector.multi_reduction <add>, %110, %cst_46 [1] : vector<8x8xf32> to vector<8xf32>
    %112 = vector.shape_cast %111 : vector<8xf32> to vector<8x1xf32>
    %113 = vector.broadcast %112 : vector<8x1xf32> to vector<8x8xf32>
    %114 = arith.divf %110, %113 : vector<8x8xf32>
    %cst_47 = arith.constant dense<0.000000e+00> : vector<8x8xf32>
    %115 = tpu.matmul %114, %101, %cst_47 {dimension_numbers = #tpu.dot_dimension_numbers<[1], [0], [0], [1], [0, 0, 1, 1], [], []>} : vector<8x8xf32>, vector<8x8xf32>, vector<8x8xf32> -> vector<8x8xf32>
    %c8_48 = arith.constant 8 : index
    %c8_49 = arith.constant 8 : index
    %116 = vector.load %arg28[%c8_48, %c8_49] : memref<16x32xf32, #tpu.memory_space<vmem>>, vector<8x8xf32>
    tpu.vector_store %arg28[%c8_48, %c8_49], %115 {strides = array<i32>} : memref<16x32xf32, #tpu.memory_space<vmem>>, vector<8x8xf32>,
    %117 = vector.extract_strided_slice %6 {offsets = [8, 16], sizes = [8, 8], strides = [1, 1]} : vector<16x96xf32> to vector<8x8xf32>
    %118 = vector.extract_strided_slice %6 {offsets = [8, 48], sizes = [8, 8], strides = [1, 1]} : vector<16x96xf32> to vector<8x8xf32>
    %119 = vector.extract_strided_slice %6 {offsets = [8, 80], sizes = [8, 8], strides = [1, 1]} : vector<16x96xf32> to vector<8x8xf32>
    %cst_50 = arith.constant dense<0.000000e+00> : vector<8x8xf32>
    %120 = tpu.matmul %117, %118, %cst_50 {dimension_numbers = #tpu.dot_dimension_numbers<[1], [1], [0], [0], [0, 0, 1, 0], [], []>} : vector<8x8xf32>, vector<8x8xf32>, vector<8x8xf32> -> vector<8x8xf32>
    %cst_51 = arith.constant 0.353553385 : f32
    %121 = vector.broadcast %cst_51 : f32 to vector<8x8xf32>
    %122 = arith.mulf %120, %121 : vector<8x8xf32>
    %123 = arith.addf %122, %80 : vector<8x8xf32>
    %cst_52 = arith.constant dense<0xFF800000> : vector<8xf32>
    %124 = vector.multi_reduction <maximumf>, %123, %cst_52 [1] : vector<8x8xf32> to vector<8xf32>
    %125 = vector.shape_cast %124 : vector<8xf32> to vector<8x1xf32>
    %126 = vector.broadcast %125 : vector<8x1xf32> to vector<8x8xf32>
    %127 = arith.subf %123, %126 : vector<8x8xf32>
    %128 = math.exp %127 : vector<8x8xf32>
    %cst_53 = arith.constant dense<0.000000e+00> : vector<8xf32>
    %129 = vector.multi_reduction <add>, %128, %cst_53 [1] : vector<8x8xf32> to vector<8xf32>
    %130 = vector.shape_cast %129 : vector<8xf32> to vector<8x1xf32>
    %131 = vector.broadcast %130 : vector<8x1xf32> to vector<8x8xf32>
    %132 = arith.divf %128, %131 : vector<8x8xf32>
    %cst_54 = arith.constant dense<0.000000e+00> : vector<8x8xf32>
    %133 = tpu.matmul %132, %119, %cst_54 {dimension_numbers = #tpu.dot_dimension_numbers<[1], [0], [0], [1], [0, 0, 1, 1], [], []>} : vector<8x8xf32>, vector<8x8xf32>, vector<8x8xf32> -> vector<8x8xf32>
    %c8_55 = arith.constant 8 : index
    %c16_56 = arith.constant 16 : index
    %134 = vector.load %arg28[%c8_55, %c16_56] : memref<16x32xf32, #tpu.memory_space<vmem>>, vector<8x8xf32>
    tpu.vector_store %arg28[%c8_55, %c16_56], %133 {strides = array<i32>} : memref<16x32xf32, #tpu.memory_space<vmem>>, vector<8x8xf32>,
    %135 = vector.extract_strided_slice %6 {offsets = [8, 24], sizes = [8, 8], strides = [1, 1]} : vector<16x96xf32> to vector<8x8xf32>
    %136 = vector.extract_strided_slice %6 {offsets = [8, 56], sizes = [8, 8], strides = [1, 1]} : vector<16x96xf32> to vector<8x8xf32>
    %137 = vector.extract_strided_slice %6 {offsets = [8, 88], sizes = [8, 8], strides = [1, 1]} : vector<16x96xf32> to vector<8x8xf32>
    %cst_57 = arith.constant dense<0.000000e+00> : vector<8x8xf32>
    %138 = tpu.matmul %135, %136, %cst_57 {dimension_numbers = #tpu.dot_dimension_numbers<[1], [1], [0], [0], [0, 0, 1, 0], [], []>} : vector<8x8xf32>, vector<8x8xf32>, vector<8x8xf32> -> vector<8x8xf32>
    %cst_58 = arith.constant 0.353553385 : f32
    %139 = vector.broadcast %cst_58 : f32 to vector<8x8xf32>
    %140 = arith.mulf %138, %139 : vector<8x8xf32>
    %141 = arith.addf %140, %80 : vector<8x8xf32>
    %cst_59 = arith.constant dense<0xFF800000> : vector<8xf32>
    %142 = vector.multi_reduction <maximumf>, %141, %cst_59 [1] : vector<8x8xf32> to vector<8xf32>
    %143 = vector.shape_cast %142 : vector<8xf32> to vector<8x1xf32>
    %144 = vector.broadcast %143 : vector<8x1xf32> to vector<8x8xf32>
    %145 = arith.subf %141, %144 : vector<8x8xf32>
    %146 = math.exp %145 : vector<8x8xf32>
    %cst_60 = arith.constant dense<0.000000e+00> : vector<8xf32>
    %147 = vector.multi_reduction <add>, %146, %cst_60 [1] : vector<8x8xf32> to vector<8xf32>
    %148 = vector.shape_cast %147 : vector<8xf32> to vector<8x1xf32>
    %149 = vector.broadcast %148 : vector<8x1xf32> to vector<8x8xf32>
    %150 = arith.divf %146, %149 : vector<8x8xf32>
    %cst_61 = arith.constant dense<0.000000e+00> : vector<8x8xf32>
    %151 = tpu.matmul %150, %137, %cst_61 {dimension_numbers = #tpu.dot_dimension_numbers<[1], [0], [0], [1], [0, 0, 1, 1], [], []>} : vector<8x8xf32>, vector<8x8xf32>, vector<8x8xf32> -> vector<8x8xf32>
    %c8_62 = arith.constant 8 : index
    %c24_63 = arith.constant 24 : index
    %152 = vector.load %arg28[%c8_62, %c24_63] : memref<16x32xf32, #tpu.memory_space<vmem>>, vector<8x8xf32>
    tpu.vector_store %arg28[%c8_62, %c24_63], %151 {strides = array<i32>} : memref<16x32xf32, #tpu.memory_space<vmem>>, vector<8x8xf32>,
    %c0_64 = arith.constant 0 : index
    %c0_65 = arith.constant 0 : index
    %153 = vector.load %arg28[%c0_64, %c0_65] : memref<16x32xf32, #tpu.memory_space<vmem>>, vector<16x32xf32>
    %c0_66 = arith.constant 0 : index
    %c0_67 = arith.constant 0 : index
    %154 = vector.load %arg6[%c0_66, %c0_67] : memref<32x32xf32, #tpu.memory_space<vmem>>, vector<32x32xf32>
    %cst_68 = arith.constant dense<0.000000e+00> : vector<16x32xf32>
    %155 = tpu.matmul %153, %154, %cst_68 {dimension_numbers = #tpu.dot_dimension_numbers<[1], [0], [0], [1], [0, 0, 1, 1], [], []>} : vector<16x32xf32>, vector<32x32xf32>, vector<16x32xf32> -> vector<16x32xf32>
    %c0_69 = arith.constant 0 : index
    %c0_70 = arith.constant 0 : index
    %156 = vector.load %arg7[%c0_69, %c0_70] : memref<1x32xf32, #tpu.memory_space<vmem>>, vector<1x32xf32>
    %157 = vector.broadcast %156 : vector<1x32xf32> to vector<16x32xf32>
    %158 = arith.addf %155, %157 : vector<16x32xf32>
    %159 = arith.addf %0, %158 : vector<16x32xf32>
    %c0_71 = arith.constant 0 : index
    %c0_72 = arith.constant 0 : index
    %160 = vector.load %arg8[%c0_71, %c0_72] : memref<1x32xf32, #tpu.memory_space<vmem>>, vector<1x32xf32>
    %c0_73 = arith.constant 0 : index
    %c0_74 = arith.constant 0 : index
    %161 = vector.load %arg9[%c0_73, %c0_74] : memref<1x32xf32, #tpu.memory_space<vmem>>, vector<1x32xf32>
    %cst_75 = arith.constant dense<0.000000e+00> : vector<16xf32>
    %162 = vector.multi_reduction <add>, %159, %cst_75 [1] : vector<16x32xf32> to vector<16xf32>
    %163 = vector.shape_cast %162 : vector<16xf32> to vector<16x1xf32>
    %cst_76 = arith.constant 3.200000e+01 : f32
    %164 = vector.broadcast %cst_76 : f32 to vector<16x1xf32>
    %165 = arith.divf %163, %164 : vector<16x1xf32>
    %166 = vector.broadcast %165 : vector<16x1xf32> to vector<16x32xf32>
    %167 = arith.subf %159, %166 : vector<16x32xf32>
    %168 = arith.mulf %167, %167 : vector<16x32xf32>
    %cst_77 = arith.constant dense<0.000000e+00> : vector<16xf32>
    %169 = vector.multi_reduction <add>, %168, %cst_77 [1] : vector<16x32xf32> to vector<16xf32>
    %170 = vector.shape_cast %169 : vector<16xf32> to vector<16x1xf32>
    %cst_78 = arith.constant 3.200000e+01 : f32
    %171 = vector.broadcast %cst_78 : f32 to vector<16x1xf32>
    %172 = arith.divf %170, %171 : vector<16x1xf32>
    %173 = vector.broadcast %165 : vector<16x1xf32> to vector<16x32xf32>
    %174 = arith.subf %159, %173 : vector<16x32xf32>
    %cst_79 = arith.constant 9.99999974E-6 : f32
    %175 = vector.broadcast %cst_79 : f32 to vector<16x1xf32>
    %176 = arith.addf %172, %175 : vector<16x1xf32>
    %177 = math.rsqrt %176 : vector<16x1xf32>
    %178 = vector.broadcast %177 : vector<16x1xf32> to vector<16x32xf32>
    %179 = arith.mulf %174, %178 : vector<16x32xf32>
    %180 = vector.broadcast %160 : vector<1x32xf32> to vector<16x32xf32>
    %181 = arith.mulf %179, %180 : vector<16x32xf32>
    %182 = vector.broadcast %161 : vector<1x32xf32> to vector<16x32xf32>
    %183 = arith.addf %181, %182 : vector<16x32xf32>
    %c0_80 = arith.constant 0 : index
    %c0_81 = arith.constant 0 : index
    %184 = vector.load %arg10[%c0_80, %c0_81] : memref<32x32xf32, #tpu.memory_space<vmem>>, vector<32x32xf32>
    %cst_82 = arith.constant dense<0.000000e+00> : vector<16x32xf32>
    %185 = tpu.matmul %183, %184, %cst_82 {dimension_numbers = #tpu.dot_dimension_numbers<[1], [0], [0], [1], [0, 0, 1, 1], [], []>} : vector<16x32xf32>, vector<32x32xf32>, vector<16x32xf32> -> vector<16x32xf32>
    %c0_83 = arith.constant 0 : index
    %c0_84 = arith.constant 0 : index
    %186 = vector.load %arg11[%c0_83, %c0_84] : memref<1x32xf32, #tpu.memory_space<vmem>>, vector<1x32xf32>
    %187 = vector.broadcast %186 : vector<1x32xf32> to vector<16x32xf32>
    %188 = arith.addf %185, %187 : vector<16x32xf32>
    %c0_85 = arith.constant 0 : index
    %c0_86 = arith.constant 0 : index
    %189 = vector.load %arg12[%c0_85, %c0_86] : memref<32x64xf32, #tpu.memory_space<vmem>>, vector<32x64xf32>
    %cst_87 = arith.constant dense<0.000000e+00> : vector<16x64xf32>
    %190 = tpu.matmul %1, %189, %cst_87 {dimension_numbers = #tpu.dot_dimension_numbers<[1], [0], [0], [1], [0, 0, 1, 1], [], []>} : vector<16x32xf32>, vector<32x64xf32>, vector<16x64xf32> -> vector<16x64xf32>
    %c0_88 = arith.constant 0 : index
    %c0_89 = arith.constant 0 : index
    %191 = vector.load %arg13[%c0_88, %c0_89] : memref<1x64xf32, #tpu.memory_space<vmem>>, vector<1x64xf32>
    %192 = vector.broadcast %191 : vector<1x64xf32> to vector<16x64xf32>
    %193 = arith.addf %190, %192 : vector<16x64xf32>
    %c0_90 = arith.constant 0 : index
    %c0_91 = arith.constant 0 : index
    %194 = vector.load %arg3[%c0_90, %c0_91] : memref<2x8xf32, #tpu.memory_space<vmem>>, vector<1x8xf32>
    %195 = vector.extract_strided_slice %188 {offsets = [0, 0], sizes = [8, 8], strides = [1, 1]} : vector<16x32xf32> to vector<8x8xf32>
    %196 = vector.extract_strided_slice %193 {offsets = [0, 0], sizes = [8, 8], strides = [1, 1]} : vector<16x64xf32> to vector<8x8xf32>
    %197 = vector.extract_strided_slice %193 {offsets = [0, 32], sizes = [8, 8], strides = [1, 1]} : vector<16x64xf32> to vector<8x8xf32>
    %cst_92 = arith.constant dense<0.000000e+00> : vector<8x8xf32>
    %198 = tpu.matmul %195, %196, %cst_92 {dimension_numbers = #tpu.dot_dimension_numbers<[1], [1], [0], [0], [0, 0, 1, 0], [], []>} : vector<8x8xf32>, vector<8x8xf32>, vector<8x8xf32> -> vector<8x8xf32>
    %cst_93 = arith.constant 0.353553385 : f32
    %199 = vector.broadcast %cst_93 : f32 to vector<8x8xf32>
    %200 = arith.mulf %198, %199 : vector<8x8xf32>
    %201 = vector.broadcast %194 : vector<1x8xf32> to vector<8x8xf32>
    %202 = arith.addf %200, %201 : vector<8x8xf32>
    %cst_94 = arith.constant dense<0xFF800000> : vector<8xf32>
    %203 = vector.multi_reduction <maximumf>, %202, %cst_94 [1] : vector<8x8xf32> to vector<8xf32>
    %204 = vector.shape_cast %203 : vector<8xf32> to vector<8x1xf32>
    %205 = vector.broadcast %204 : vector<8x1xf32> to vector<8x8xf32>
    %206 = arith.subf %202, %205 : vector<8x8xf32>
    %207 = math.exp %206 : vector<8x8xf32>
    %cst_95 = arith.constant dense<0.000000e+00> : vector<8xf32>
    %208 = vector.multi_reduction <add>, %207, %cst_95 [1] : vector<8x8xf32> to vector<8xf32>
    %209 = vector.shape_cast %208 : vector<8xf32> to vector<8x1xf32>
    %210 = vector.broadcast %209 : vector<8x1xf32> to vector<8x8xf32>
    %211 = arith.divf %207, %210 : vector<8x8xf32>
    %c0_96 = arith.constant 0 : index
    %c0_97 = arith.constant 0 : index
    %212 = vector.load %arg27[%c0_96, %c0_97] : memref<64x8xf32, #tpu.memory_space<vmem>>, vector<8x8xf32>
    tpu.vector_store %arg27[%c0_96, %c0_97], %211 {strides = array<i32>} : memref<64x8xf32, #tpu.memory_space<vmem>>, vector<8x8xf32>,
    %cst_98 = arith.constant dense<0.000000e+00> : vector<8x8xf32>
    %213 = tpu.matmul %211, %197, %cst_98 {dimension_numbers = #tpu.dot_dimension_numbers<[1], [0], [0], [1], [0, 0, 1, 1], [], []>} : vector<8x8xf32>, vector<8x8xf32>, vector<8x8xf32> -> vector<8x8xf32>
    %c0_99 = arith.constant 0 : index
    %c0_100 = arith.constant 0 : index
    %214 = vector.load %arg28[%c0_99, %c0_100] : memref<16x32xf32, #tpu.memory_space<vmem>>, vector<8x8xf32>
    tpu.vector_store %arg28[%c0_99, %c0_100], %213 {strides = array<i32>} : memref<16x32xf32, #tpu.memory_space<vmem>>, vector<8x8xf32>,
    %215 = vector.extract_strided_slice %188 {offsets = [0, 8], sizes = [8, 8], strides = [1, 1]} : vector<16x32xf32> to vector<8x8xf32>
    %216 = vector.extract_strided_slice %193 {offsets = [0, 8], sizes = [8, 8], strides = [1, 1]} : vector<16x64xf32> to vector<8x8xf32>
    %217 = vector.extract_strided_slice %193 {offsets = [0, 40], sizes = [8, 8], strides = [1, 1]} : vector<16x64xf32> to vector<8x8xf32>
    %cst_101 = arith.constant dense<0.000000e+00> : vector<8x8xf32>
    %218 = tpu.matmul %215, %216, %cst_101 {dimension_numbers = #tpu.dot_dimension_numbers<[1], [1], [0], [0], [0, 0, 1, 0], [], []>} : vector<8x8xf32>, vector<8x8xf32>, vector<8x8xf32> -> vector<8x8xf32>
    %cst_102 = arith.constant 0.353553385 : f32
    %219 = vector.broadcast %cst_102 : f32 to vector<8x8xf32>
    %220 = arith.mulf %218, %219 : vector<8x8xf32>
    %221 = vector.broadcast %194 : vector<1x8xf32> to vector<8x8xf32>
    %222 = arith.addf %220, %221 : vector<8x8xf32>
    %cst_103 = arith.constant dense<0xFF800000> : vector<8xf32>
    %223 = vector.multi_reduction <maximumf>, %222, %cst_103 [1] : vector<8x8xf32> to vector<8xf32>
    %224 = vector.shape_cast %223 : vector<8xf32> to vector<8x1xf32>
    %225 = vector.broadcast %224 : vector<8x1xf32> to vector<8x8xf32>
    %226 = arith.subf %222, %225 : vector<8x8xf32>
    %227 = math.exp %226 : vector<8x8xf32>
    %cst_104 = arith.constant dense<0.000000e+00> : vector<8xf32>
    %228 = vector.multi_reduction <add>, %227, %cst_104 [1] : vector<8x8xf32> to vector<8xf32>
    %229 = vector.shape_cast %228 : vector<8xf32> to vector<8x1xf32>
    %230 = vector.broadcast %229 : vector<8x1xf32> to vector<8x8xf32>
    %231 = arith.divf %227, %230 : vector<8x8xf32>
    %c8_105 = arith.constant 8 : index
    %c0_106 = arith.constant 0 : index
    %232 = vector.load %arg27[%c8_105, %c0_106] : memref<64x8xf32, #tpu.memory_space<vmem>>, vector<8x8xf32>
    tpu.vector_store %arg27[%c8_105, %c0_106], %231 {strides = array<i32>} : memref<64x8xf32, #tpu.memory_space<vmem>>, vector<8x8xf32>,
    %cst_107 = arith.constant dense<0.000000e+00> : vector<8x8xf32>
    %233 = tpu.matmul %231, %217, %cst_107 {dimension_numbers = #tpu.dot_dimension_numbers<[1], [0], [0], [1], [0, 0, 1, 1], [], []>} : vector<8x8xf32>, vector<8x8xf32>, vector<8x8xf32> -> vector<8x8xf32>
    %c0_108 = arith.constant 0 : index
    %c8_109 = arith.constant 8 : index
    %234 = vector.load %arg28[%c0_108, %c8_109] : memref<16x32xf32, #tpu.memory_space<vmem>>, vector<8x8xf32>
    tpu.vector_store %arg28[%c0_108, %c8_109], %233 {strides = array<i32>} : memref<16x32xf32, #tpu.memory_space<vmem>>, vector<8x8xf32>,
    %235 = vector.extract_strided_slice %188 {offsets = [0, 16], sizes = [8, 8], strides = [1, 1]} : vector<16x32xf32> to vector<8x8xf32>
    %236 = vector.extract_strided_slice %193 {offsets = [0, 16], sizes = [8, 8], strides = [1, 1]} : vector<16x64xf32> to vector<8x8xf32>
    %237 = vector.extract_strided_slice %193 {offsets = [0, 48], sizes = [8, 8], strides = [1, 1]} : vector<16x64xf32> to vector<8x8xf32>
    %cst_110 = arith.constant dense<0.000000e+00> : vector<8x8xf32>
    %238 = tpu.matmul %235, %236, %cst_110 {dimension_numbers = #tpu.dot_dimension_numbers<[1], [1], [0], [0], [0, 0, 1, 0], [], []>} : vector<8x8xf32>, vector<8x8xf32>, vector<8x8xf32> -> vector<8x8xf32>
    %cst_111 = arith.constant 0.353553385 : f32
    %239 = vector.broadcast %cst_111 : f32 to vector<8x8xf32>
    %240 = arith.mulf %238, %239 : vector<8x8xf32>
    %241 = vector.broadcast %194 : vector<1x8xf32> to vector<8x8xf32>
    %242 = arith.addf %240, %241 : vector<8x8xf32>
    %cst_112 = arith.constant dense<0xFF800000> : vector<8xf32>
    %243 = vector.multi_reduction <maximumf>, %242, %cst_112 [1] : vector<8x8xf32> to vector<8xf32>
    %244 = vector.shape_cast %243 : vector<8xf32> to vector<8x1xf32>
    %245 = vector.broadcast %244 : vector<8x1xf32> to vector<8x8xf32>
    %246 = arith.subf %242, %245 : vector<8x8xf32>
    %247 = math.exp %246 : vector<8x8xf32>
    %cst_113 = arith.constant dense<0.000000e+00> : vector<8xf32>
    %248 = vector.multi_reduction <add>, %247, %cst_113 [1] : vector<8x8xf32> to vector<8xf32>
    %249 = vector.shape_cast %248 : vector<8xf32> to vector<8x1xf32>
    %250 = vector.broadcast %249 : vector<8x1xf32> to vector<8x8xf32>
    %251 = arith.divf %247, %250 : vector<8x8xf32>
    %c16_114 = arith.constant 16 : index
    %c0_115 = arith.constant 0 : index
    %252 = vector.load %arg27[%c16_114, %c0_115] : memref<64x8xf32, #tpu.memory_space<vmem>>, vector<8x8xf32>
    tpu.vector_store %arg27[%c16_114, %c0_115], %251 {strides = array<i32>} : memref<64x8xf32, #tpu.memory_space<vmem>>, vector<8x8xf32>,
    %cst_116 = arith.constant dense<0.000000e+00> : vector<8x8xf32>
    %253 = tpu.matmul %251, %237, %cst_116 {dimension_numbers = #tpu.dot_dimension_numbers<[1], [0], [0], [1], [0, 0, 1, 1], [], []>} : vector<8x8xf32>, vector<8x8xf32>, vector<8x8xf32> -> vector<8x8xf32>
    %c0_117 = arith.constant 0 : index
    %c16_118 = arith.constant 16 : index
    %254 = vector.load %arg28[%c0_117, %c16_118] : memref<16x32xf32, #tpu.memory_space<vmem>>, vector<8x8xf32>
    tpu.vector_store %arg28[%c0_117, %c16_118], %253 {strides = array<i32>} : memref<16x32xf32, #tpu.memory_space<vmem>>, vector<8x8xf32>,
    %255 = vector.extract_strided_slice %188 {offsets = [0, 24], sizes = [8, 8], strides = [1, 1]} : vector<16x32xf32> to vector<8x8xf32>
    %256 = vector.extract_strided_slice %193 {offsets = [0, 24], sizes = [8, 8], strides = [1, 1]} : vector<16x64xf32> to vector<8x8xf32>
    %257 = vector.extract_strided_slice %193 {offsets = [0, 56], sizes = [8, 8], strides = [1, 1]} : vector<16x64xf32> to vector<8x8xf32>
    %cst_119 = arith.constant dense<0.000000e+00> : vector<8x8xf32>
    %258 = tpu.matmul %255, %256, %cst_119 {dimension_numbers = #tpu.dot_dimension_numbers<[1], [1], [0], [0], [0, 0, 1, 0], [], []>} : vector<8x8xf32>, vector<8x8xf32>, vector<8x8xf32> -> vector<8x8xf32>
    %cst_120 = arith.constant 0.353553385 : f32
    %259 = vector.broadcast %cst_120 : f32 to vector<8x8xf32>
    %260 = arith.mulf %258, %259 : vector<8x8xf32>
    %261 = vector.broadcast %194 : vector<1x8xf32> to vector<8x8xf32>
    %262 = arith.addf %260, %261 : vector<8x8xf32>
    %cst_121 = arith.constant dense<0xFF800000> : vector<8xf32>
    %263 = vector.multi_reduction <maximumf>, %262, %cst_121 [1] : vector<8x8xf32> to vector<8xf32>
    %264 = vector.shape_cast %263 : vector<8xf32> to vector<8x1xf32>
    %265 = vector.broadcast %264 : vector<8x1xf32> to vector<8x8xf32>
    %266 = arith.subf %262, %265 : vector<8x8xf32>
    %267 = math.exp %266 : vector<8x8xf32>
    %cst_122 = arith.constant dense<0.000000e+00> : vector<8xf32>
    %268 = vector.multi_reduction <add>, %267, %cst_122 [1] : vector<8x8xf32> to vector<8xf32>
    %269 = vector.shape_cast %268 : vector<8xf32> to vector<8x1xf32>
    %270 = vector.broadcast %269 : vector<8x1xf32> to vector<8x8xf32>
    %271 = arith.divf %267, %270 : vector<8x8xf32>
    %c24_123 = arith.constant 24 : index
    %c0_124 = arith.constant 0 : index
    %272 = vector.load %arg27[%c24_123, %c0_124] : memref<64x8xf32, #tpu.memory_space<vmem>>, vector<8x8xf32>
    tpu.vector_store %arg27[%c24_123, %c0_124], %271 {strides = array<i32>} : memref<64x8xf32, #tpu.memory_space<vmem>>, vector<8x8xf32>,
    %cst_125 = arith.constant dense<0.000000e+00> : vector<8x8xf32>
    %273 = tpu.matmul %271, %257, %cst_125 {dimension_numbers = #tpu.dot_dimension_numbers<[1], [0], [0], [1], [0, 0, 1, 1], [], []>} : vector<8x8xf32>, vector<8x8xf32>, vector<8x8xf32> -> vector<8x8xf32>
    %c0_126 = arith.constant 0 : index
    %c24_127 = arith.constant 24 : index
    %274 = vector.load %arg28[%c0_126, %c24_127] : memref<16x32xf32, #tpu.memory_space<vmem>>, vector<8x8xf32>
    tpu.vector_store %arg28[%c0_126, %c24_127], %273 {strides = array<i32>} : memref<16x32xf32, #tpu.memory_space<vmem>>, vector<8x8xf32>,
    %c1 = arith.constant 1 : index
    %c0_128 = arith.constant 0 : index
    %275 = vector.load %arg3[%c1, %c0_128] : memref<2x8xf32, #tpu.memory_space<vmem>>, vector<1x8xf32>
    %276 = vector.extract_strided_slice %188 {offsets = [8, 0], sizes = [8, 8], strides = [1, 1]} : vector<16x32xf32> to vector<8x8xf32>
    %277 = vector.extract_strided_slice %193 {offsets = [8, 0], sizes = [8, 8], strides = [1, 1]} : vector<16x64xf32> to vector<8x8xf32>
    %278 = vector.extract_strided_slice %193 {offsets = [8, 32], sizes = [8, 8], strides = [1, 1]} : vector<16x64xf32> to vector<8x8xf32>
    %cst_129 = arith.constant dense<0.000000e+00> : vector<8x8xf32>
    %279 = tpu.matmul %276, %277, %cst_129 {dimension_numbers = #tpu.dot_dimension_numbers<[1], [1], [0], [0], [0, 0, 1, 0], [], []>} : vector<8x8xf32>, vector<8x8xf32>, vector<8x8xf32> -> vector<8x8xf32>
    %cst_130 = arith.constant 0.353553385 : f32
    %280 = vector.broadcast %cst_130 : f32 to vector<8x8xf32>
    %281 = arith.mulf %279, %280 : vector<8x8xf32>
    %282 = vector.broadcast %275 : vector<1x8xf32> to vector<8x8xf32>
    %283 = arith.addf %281, %282 : vector<8x8xf32>
    %cst_131 = arith.constant dense<0xFF800000> : vector<8xf32>
    %284 = vector.multi_reduction <maximumf>, %283, %cst_131 [1] : vector<8x8xf32> to vector<8xf32>
    %285 = vector.shape_cast %284 : vector<8xf32> to vector<8x1xf32>
    %286 = vector.broadcast %285 : vector<8x1xf32> to vector<8x8xf32>
    %287 = arith.subf %283, %286 : vector<8x8xf32>
    %288 = math.exp %287 : vector<8x8xf32>
    %cst_132 = arith.constant dense<0.000000e+00> : vector<8xf32>
    %289 = vector.multi_reduction <add>, %288, %cst_132 [1] : vector<8x8xf32> to vector<8xf32>
    %290 = vector.shape_cast %289 : vector<8xf32> to vector<8x1xf32>
    %291 = vector.broadcast %290 : vector<8x1xf32> to vector<8x8xf32>
    %292 = arith.divf %288, %291 : vector<8x8xf32>
    %c32 = arith.constant 32 : index
    %c0_133 = arith.constant 0 : index
    %293 = vector.load %arg27[%c32, %c0_133] : memref<64x8xf32, #tpu.memory_space<vmem>>, vector<8x8xf32>
    tpu.vector_store %arg27[%c32, %c0_133], %292 {strides = array<i32>} : memref<64x8xf32, #tpu.memory_space<vmem>>, vector<8x8xf32>,
    %cst_134 = arith.constant dense<0.000000e+00> : vector<8x8xf32>
    %294 = tpu.matmul %292, %278, %cst_134 {dimension_numbers = #tpu.dot_dimension_numbers<[1], [0], [0], [1], [0, 0, 1, 1], [], []>} : vector<8x8xf32>, vector<8x8xf32>, vector<8x8xf32> -> vector<8x8xf32>
    %c8_135 = arith.constant 8 : index
    %c0_136 = arith.constant 0 : index
    %295 = vector.load %arg28[%c8_135, %c0_136] : memref<16x32xf32, #tpu.memory_space<vmem>>, vector<8x8xf32>
    tpu.vector_store %arg28[%c8_135, %c0_136], %294 {strides = array<i32>} : memref<16x32xf32, #tpu.memory_space<vmem>>, vector<8x8xf32>,
    %296 = vector.extract_strided_slice %188 {offsets = [8, 8], sizes = [8, 8], strides = [1, 1]} : vector<16x32xf32> to vector<8x8xf32>
    %297 = vector.extract_strided_slice %193 {offsets = [8, 8], sizes = [8, 8], strides = [1, 1]} : vector<16x64xf32> to vector<8x8xf32>
    %298 = vector.extract_strided_slice %193 {offsets = [8, 40], sizes = [8, 8], strides = [1, 1]} : vector<16x64xf32> to vector<8x8xf32>
    %cst_137 = arith.constant dense<0.000000e+00> : vector<8x8xf32>
    %299 = tpu.matmul %296, %297, %cst_137 {dimension_numbers = #tpu.dot_dimension_numbers<[1], [1], [0], [0], [0, 0, 1, 0], [], []>} : vector<8x8xf32>, vector<8x8xf32>, vector<8x8xf32> -> vector<8x8xf32>
    %cst_138 = arith.constant 0.353553385 : f32
    %300 = vector.broadcast %cst_138 : f32 to vector<8x8xf32>
    %301 = arith.mulf %299, %300 : vector<8x8xf32>
    %302 = vector.broadcast %275 : vector<1x8xf32> to vector<8x8xf32>
    %303 = arith.addf %301, %302 : vector<8x8xf32>
    %cst_139 = arith.constant dense<0xFF800000> : vector<8xf32>
    %304 = vector.multi_reduction <maximumf>, %303, %cst_139 [1] : vector<8x8xf32> to vector<8xf32>
    %305 = vector.shape_cast %304 : vector<8xf32> to vector<8x1xf32>
    %306 = vector.broadcast %305 : vector<8x1xf32> to vector<8x8xf32>
    %307 = arith.subf %303, %306 : vector<8x8xf32>
    %308 = math.exp %307 : vector<8x8xf32>
    %cst_140 = arith.constant dense<0.000000e+00> : vector<8xf32>
    %309 = vector.multi_reduction <add>, %308, %cst_140 [1] : vector<8x8xf32> to vector<8xf32>
    %310 = vector.shape_cast %309 : vector<8xf32> to vector<8x1xf32>
    %311 = vector.broadcast %310 : vector<8x1xf32> to vector<8x8xf32>
    %312 = arith.divf %308, %311 : vector<8x8xf32>
    %c40 = arith.constant 40 : index
    %c0_141 = arith.constant 0 : index
    %313 = vector.load %arg27[%c40, %c0_141] : memref<64x8xf32, #tpu.memory_space<vmem>>, vector<8x8xf32>
    tpu.vector_store %arg27[%c40, %c0_141], %312 {strides = array<i32>} : memref<64x8xf32, #tpu.memory_space<vmem>>, vector<8x8xf32>,
    %cst_142 = arith.constant dense<0.000000e+00> : vector<8x8xf32>
    %314 = tpu.matmul %312, %298, %cst_142 {dimension_numbers = #tpu.dot_dimension_numbers<[1], [0], [0], [1], [0, 0, 1, 1], [], []>} : vector<8x8xf32>, vector<8x8xf32>, vector<8x8xf32> -> vector<8x8xf32>
    %c8_143 = arith.constant 8 : index
    %c8_144 = arith.constant 8 : index
    %315 = vector.load %arg28[%c8_143, %c8_144] : memref<16x32xf32, #tpu.memory_space<vmem>>, vector<8x8xf32>
    tpu.vector_store %arg28[%c8_143, %c8_144], %314 {strides = array<i32>} : memref<16x32xf32, #tpu.memory_space<vmem>>, vector<8x8xf32>,
    %316 = vector.extract_strided_slice %188 {offsets = [8, 16], sizes = [8, 8], strides = [1, 1]} : vector<16x32xf32> to vector<8x8xf32>
    %317 = vector.extract_strided_slice %193 {offsets = [8, 16], sizes = [8, 8], strides = [1, 1]} : vector<16x64xf32> to vector<8x8xf32>
    %318 = vector.extract_strided_slice %193 {offsets = [8, 48], sizes = [8, 8], strides = [1, 1]} : vector<16x64xf32> to vector<8x8xf32>
    %cst_145 = arith.constant dense<0.000000e+00> : vector<8x8xf32>
    %319 = tpu.matmul %316, %317, %cst_145 {dimension_numbers = #tpu.dot_dimension_numbers<[1], [1], [0], [0], [0, 0, 1, 0], [], []>} : vector<8x8xf32>, vector<8x8xf32>, vector<8x8xf32> -> vector<8x8xf32>
    %cst_146 = arith.constant 0.353553385 : f32
    %320 = vector.broadcast %cst_146 : f32 to vector<8x8xf32>
    %321 = arith.mulf %319, %320 : vector<8x8xf32>
    %322 = vector.broadcast %275 : vector<1x8xf32> to vector<8x8xf32>
    %323 = arith.addf %321, %322 : vector<8x8xf32>
    %cst_147 = arith.constant dense<0xFF800000> : vector<8xf32>
    %324 = vector.multi_reduction <maximumf>, %323, %cst_147 [1] : vector<8x8xf32> to vector<8xf32>
    %325 = vector.shape_cast %324 : vector<8xf32> to vector<8x1xf32>
    %326 = vector.broadcast %325 : vector<8x1xf32> to vector<8x8xf32>
    %327 = arith.subf %323, %326 : vector<8x8xf32>
    %328 = math.exp %327 : vector<8x8xf32>
    %cst_148 = arith.constant dense<0.000000e+00> : vector<8xf32>
    %329 = vector.multi_reduction <add>, %328, %cst_148 [1] : vector<8x8xf32> to vector<8xf32>
    %330 = vector.shape_cast %329 : vector<8xf32> to vector<8x1xf32>
    %331 = vector.broadcast %330 : vector<8x1xf32> to vector<8x8xf32>
    %332 = arith.divf %328, %331 : vector<8x8xf32>
    %c48 = arith.constant 48 : index
    %c0_149 = arith.constant 0 : index
    %333 = vector.load %arg27[%c48, %c0_149] : memref<64x8xf32, #tpu.memory_space<vmem>>, vector<8x8xf32>
    tpu.vector_store %arg27[%c48, %c0_149], %332 {strides = array<i32>} : memref<64x8xf32, #tpu.memory_space<vmem>>, vector<8x8xf32>,
    %cst_150 = arith.constant dense<0.000000e+00> : vector<8x8xf32>
    %334 = tpu.matmul %332, %318, %cst_150 {dimension_numbers = #tpu.dot_dimension_numbers<[1], [0], [0], [1], [0, 0, 1, 1], [], []>} : vector<8x8xf32>, vector<8x8xf32>, vector<8x8xf32> -> vector<8x8xf32>
    %c8_151 = arith.constant 8 : index
    %c16_152 = arith.constant 16 : index
    %335 = vector.load %arg28[%c8_151, %c16_152] : memref<16x32xf32, #tpu.memory_space<vmem>>, vector<8x8xf32>
    tpu.vector_store %arg28[%c8_151, %c16_152], %334 {strides = array<i32>} : memref<16x32xf32, #tpu.memory_space<vmem>>, vector<8x8xf32>,
    %336 = vector.extract_strided_slice %188 {offsets = [8, 24], sizes = [8, 8], strides = [1, 1]} : vector<16x32xf32> to vector<8x8xf32>
    %337 = vector.extract_strided_slice %193 {offsets = [8, 24], sizes = [8, 8], strides = [1, 1]} : vector<16x64xf32> to vector<8x8xf32>
    %338 = vector.extract_strided_slice %193 {offsets = [8, 56], sizes = [8, 8], strides = [1, 1]} : vector<16x64xf32> to vector<8x8xf32>
    %cst_153 = arith.constant dense<0.000000e+00> : vector<8x8xf32>
    %339 = tpu.matmul %336, %337, %cst_153 {dimension_numbers = #tpu.dot_dimension_numbers<[1], [1], [0], [0], [0, 0, 1, 0], [], []>} : vector<8x8xf32>, vector<8x8xf32>, vector<8x8xf32> -> vector<8x8xf32>
    %cst_154 = arith.constant 0.353553385 : f32
    %340 = vector.broadcast %cst_154 : f32 to vector<8x8xf32>
    %341 = arith.mulf %339, %340 : vector<8x8xf32>
    %342 = vector.broadcast %275 : vector<1x8xf32> to vector<8x8xf32>
    %343 = arith.addf %341, %342 : vector<8x8xf32>
    %cst_155 = arith.constant dense<0xFF800000> : vector<8xf32>
    %344 = vector.multi_reduction <maximumf>, %343, %cst_155 [1] : vector<8x8xf32> to vector<8xf32>
    %345 = vector.shape_cast %344 : vector<8xf32> to vector<8x1xf32>
    %346 = vector.broadcast %345 : vector<8x1xf32> to vector<8x8xf32>
    %347 = arith.subf %343, %346 : vector<8x8xf32>
    %348 = math.exp %347 : vector<8x8xf32>
    %cst_156 = arith.constant dense<0.000000e+00> : vector<8xf32>
    %349 = vector.multi_reduction <add>, %348, %cst_156 [1] : vector<8x8xf32> to vector<8xf32>
    %350 = vector.shape_cast %349 : vector<8xf32> to vector<8x1xf32>
    %351 = vector.broadcast %350 : vector<8x1xf32> to vector<8x8xf32>
    %352 = arith.divf %348, %351 : vector<8x8xf32>
    %c56 = arith.constant 56 : index
    %c0_157 = arith.constant 0 : index
    %353 = vector.load %arg27[%c56, %c0_157] : memref<64x8xf32, #tpu.memory_space<vmem>>, vector<8x8xf32>
    tpu.vector_store %arg27[%c56, %c0_157], %352 {strides = array<i32>} : memref<64x8xf32, #tpu.memory_space<vmem>>, vector<8x8xf32>,
    %cst_158 = arith.constant dense<0.000000e+00> : vector<8x8xf32>
    %354 = tpu.matmul %352, %338, %cst_158 {dimension_numbers = #tpu.dot_dimension_numbers<[1], [0], [0], [1], [0, 0, 1, 1], [], []>} : vector<8x8xf32>, vector<8x8xf32>, vector<8x8xf32> -> vector<8x8xf32>
    %c8_159 = arith.constant 8 : index
    %c24_160 = arith.constant 24 : index
    %355 = vector.load %arg28[%c8_159, %c24_160] : memref<16x32xf32, #tpu.memory_space<vmem>>, vector<8x8xf32>
    tpu.vector_store %arg28[%c8_159, %c24_160], %354 {strides = array<i32>} : memref<16x32xf32, #tpu.memory_space<vmem>>, vector<8x8xf32>,
    %c0_161 = arith.constant 0 : index
    %c0_162 = arith.constant 0 : index
    %356 = vector.load %arg28[%c0_161, %c0_162] : memref<16x32xf32, #tpu.memory_space<vmem>>, vector<16x32xf32>
    %c0_163 = arith.constant 0 : index
    %c0_164 = arith.constant 0 : index
    %357 = vector.load %arg14[%c0_163, %c0_164] : memref<32x32xf32, #tpu.memory_space<vmem>>, vector<32x32xf32>
    %cst_165 = arith.constant dense<0.000000e+00> : vector<16x32xf32>
    %358 = tpu.matmul %356, %357, %cst_165 {dimension_numbers = #tpu.dot_dimension_numbers<[1], [0], [0], [1], [0, 0, 1, 1], [], []>} : vector<16x32xf32>, vector<32x32xf32>, vector<16x32xf32> -> vector<16x32xf32>
    %c0_166 = arith.constant 0 : index
    %c0_167 = arith.constant 0 : index
    %359 = vector.load %arg15[%c0_166, %c0_167] : memref<1x32xf32, #tpu.memory_space<vmem>>, vector<1x32xf32>
    %360 = vector.broadcast %359 : vector<1x32xf32> to vector<16x32xf32>
    %361 = arith.addf %358, %360 : vector<16x32xf32>
    %362 = arith.addf %183, %361 : vector<16x32xf32>
    %c0_168 = arith.constant 0 : index
    %c0_169 = arith.constant 0 : index
    %363 = vector.load %arg16[%c0_168, %c0_169] : memref<1x32xf32, #tpu.memory_space<vmem>>, vector<1x32xf32>
    %c0_170 = arith.constant 0 : index
    %c0_171 = arith.constant 0 : index
    %364 = vector.load %arg17[%c0_170, %c0_171] : memref<1x32xf32, #tpu.memory_space<vmem>>, vector<1x32xf32>
    %cst_172 = arith.constant dense<0.000000e+00> : vector<16xf32>
    %365 = vector.multi_reduction <add>, %362, %cst_172 [1] : vector<16x32xf32> to vector<16xf32>
    %366 = vector.shape_cast %365 : vector<16xf32> to vector<16x1xf32>
    %cst_173 = arith.constant 3.200000e+01 : f32
    %367 = vector.broadcast %cst_173 : f32 to vector<16x1xf32>
    %368 = arith.divf %366, %367 : vector<16x1xf32>
    %369 = vector.broadcast %368 : vector<16x1xf32> to vector<16x32xf32>
    %370 = arith.subf %362, %369 : vector<16x32xf32>
    %371 = arith.mulf %370, %370 : vector<16x32xf32>
    %cst_174 = arith.constant dense<0.000000e+00> : vector<16xf32>
    %372 = vector.multi_reduction <add>, %371, %cst_174 [1] : vector<16x32xf32> to vector<16xf32>
    %373 = vector.shape_cast %372 : vector<16xf32> to vector<16x1xf32>
    %cst_175 = arith.constant 3.200000e+01 : f32
    %374 = vector.broadcast %cst_175 : f32 to vector<16x1xf32>
    %375 = arith.divf %373, %374 : vector<16x1xf32>
    %376 = vector.broadcast %368 : vector<16x1xf32> to vector<16x32xf32>
    %377 = arith.subf %362, %376 : vector<16x32xf32>
    %cst_176 = arith.constant 9.99999974E-6 : f32
    %378 = vector.broadcast %cst_176 : f32 to vector<16x1xf32>
    %379 = arith.addf %375, %378 : vector<16x1xf32>
    %380 = math.rsqrt %379 : vector<16x1xf32>
    %381 = vector.broadcast %380 : vector<16x1xf32> to vector<16x32xf32>
    %382 = arith.mulf %377, %381 : vector<16x32xf32>
    %383 = vector.broadcast %363 : vector<1x32xf32> to vector<16x32xf32>
    %384 = arith.mulf %382, %383 : vector<16x32xf32>
    %385 = vector.broadcast %364 : vector<1x32xf32> to vector<16x32xf32>
    %386 = arith.addf %384, %385 : vector<16x32xf32>
    %c0_177 = arith.constant 0 : index
    %c0_178 = arith.constant 0 : index
    %387 = vector.load %arg18[%c0_177, %c0_178] : memref<32x64xf32, #tpu.memory_space<vmem>>, vector<32x64xf32>
    %cst_179 = arith.constant dense<0.000000e+00> : vector<16x64xf32>
    %388 = tpu.matmul %386, %387, %cst_179 {dimension_numbers = #tpu.dot_dimension_numbers<[1], [0], [0], [1], [0, 0, 1, 1], [], []>} : vector<16x32xf32>, vector<32x64xf32>, vector<16x64xf32> -> vector<16x64xf32>
    %c0_180 = arith.constant 0 : index
    %c0_181 = arith.constant 0 : index
    %389 = vector.load %arg19[%c0_180, %c0_181] : memref<1x64xf32, #tpu.memory_space<vmem>>, vector<1x64xf32>
    %390 = vector.broadcast %389 : vector<1x64xf32> to vector<16x64xf32>
    %391 = arith.addf %388, %390 : vector<16x64xf32>
    %cst_182 = arith.constant 0.000000e+00 : f32
    %392 = vector.broadcast %cst_182 : f32 to vector<16x64xf32>
    %393 = arith.maximumf %391, %392 : vector<16x64xf32>
    %c0_183 = arith.constant 0 : index
    %c0_184 = arith.constant 0 : index
    %394 = vector.load %arg20[%c0_183, %c0_184] : memref<64x32xf32, #tpu.memory_space<vmem>>, vector<64x32xf32>
    %cst_185 = arith.constant dense<0.000000e+00> : vector<16x32xf32>
    %395 = tpu.matmul %393, %394, %cst_185 {dimension_numbers = #tpu.dot_dimension_numbers<[1], [0], [0], [1], [0, 0, 1, 1], [], []>} : vector<16x64xf32>, vector<64x32xf32>, vector<16x32xf32> -> vector<16x32xf32>
    %c0_186 = arith.constant 0 : index
    %c0_187 = arith.constant 0 : index
    %396 = vector.load %arg21[%c0_186, %c0_187] : memref<1x32xf32, #tpu.memory_space<vmem>>, vector<1x32xf32>
    %397 = vector.broadcast %396 : vector<1x32xf32> to vector<16x32xf32>
    %398 = arith.addf %395, %397 : vector<16x32xf32>
    %399 = arith.addf %386, %398 : vector<16x32xf32>
    %c0_188 = arith.constant 0 : index
    %c0_189 = arith.constant 0 : index
    %400 = vector.load %arg22[%c0_188, %c0_189] : memref<1x32xf32, #tpu.memory_space<vmem>>, vector<1x32xf32>
    %c0_190 = arith.constant 0 : index
    %c0_191 = arith.constant 0 : index
    %401 = vector.load %arg23[%c0_190, %c0_191] : memref<1x32xf32, #tpu.memory_space<vmem>>, vector<1x32xf32>
    %cst_192 = arith.constant dense<0.000000e+00> : vector<16xf32>
    %402 = vector.multi_reduction <add>, %399, %cst_192 [1] : vector<16x32xf32> to vector<16xf32>
    %403 = vector.shape_cast %402 : vector<16xf32> to vector<16x1xf32>
    %cst_193 = arith.constant 3.200000e+01 : f32
    %404 = vector.broadcast %cst_193 : f32 to vector<16x1xf32>
    %405 = arith.divf %403, %404 : vector<16x1xf32>
    %406 = vector.broadcast %405 : vector<16x1xf32> to vector<16x32xf32>
    %407 = arith.subf %399, %406 : vector<16x32xf32>
    %408 = arith.mulf %407, %407 : vector<16x32xf32>
    %cst_194 = arith.constant dense<0.000000e+00> : vector<16xf32>
    %409 = vector.multi_reduction <add>, %408, %cst_194 [1] : vector<16x32xf32> to vector<16xf32>
    %410 = vector.shape_cast %409 : vector<16xf32> to vector<16x1xf32>
    %cst_195 = arith.constant 3.200000e+01 : f32
    %411 = vector.broadcast %cst_195 : f32 to vector<16x1xf32>
    %412 = arith.divf %410, %411 : vector<16x1xf32>
    %413 = vector.broadcast %405 : vector<16x1xf32> to vector<16x32xf32>
    %414 = arith.subf %399, %413 : vector<16x32xf32>
    %cst_196 = arith.constant 9.99999974E-6 : f32
    %415 = vector.broadcast %cst_196 : f32 to vector<16x1xf32>
    %416 = arith.addf %412, %415 : vector<16x1xf32>
    %417 = math.rsqrt %416 : vector<16x1xf32>
    %418 = vector.broadcast %417 : vector<16x1xf32> to vector<16x32xf32>
    %419 = arith.mulf %414, %418 : vector<16x32xf32>
    %420 = vector.broadcast %400 : vector<1x32xf32> to vector<16x32xf32>
    %421 = arith.mulf %419, %420 : vector<16x32xf32>
    %422 = vector.broadcast %401 : vector<1x32xf32> to vector<16x32xf32>
    %423 = arith.addf %421, %422 : vector<16x32xf32>
    %c0_197 = arith.constant 0 : index
    %c0_198 = arith.constant 0 : index
    %424 = vector.load %arg24[%c0_197, %c0_198] : memref<32x128xf32, #tpu.memory_space<vmem>>, vector<32x128xf32>
    %cst_199 = arith.constant dense<0.000000e+00> : vector<16x128xf32>
    %425 = tpu.matmul %423, %424, %cst_199 {dimension_numbers = #tpu.dot_dimension_numbers<[1], [0], [0], [1], [0, 0, 1, 1], [], []>} : vector<16x32xf32>, vector<32x128xf32>, vector<16x128xf32> -> vector<16x128xf32>
    %c0_200 = arith.constant 0 : index
    %c0_201 = arith.constant 0 : index
    %426 = vector.load %arg25[%c0_200, %c0_201] : memref<1x128xf32, #tpu.memory_space<vmem>>, vector<1x128xf32>
    %427 = vector.broadcast %426 : vector<1x128xf32> to vector<16x128xf32>
    %428 = arith.addf %425, %427 : vector<16x128xf32>
    %c0_202 = arith.constant 0 : index
    %c0_203 = arith.constant 0 : index
    %429 = vector.load %arg26[%c0_202, %c0_203] : memref<16x128xf32, #tpu.memory_space<vmem>>, vector<16x128xf32>
    tpu.vector_store %arg26[%c0_202, %c0_203], %428 {strides = array<i32>} : memref<16x128xf32, #tpu.memory_space<vmem>>, vector<16x128xf32>,
    return
  }
}

</mosaic_0001>

<bundles_post_ra>
// kernel: seq2seq_forward.1
= control target key start
LH: loop header
LB: loop body
LE: loop exit
PB: predicated region body
PF: predicated region fallthrough
CT: control target
= control target key end

     0   :  { %s5065_s0 = inlined_call_operand.vmem [shape: f32[16,32], index: 0, kind: input, shape index: {}]   ;;  %s5066_s1 = inlined_call_operand.vmem [shape: f32[16,32], index: 1, kind: input, shape index: {}]   ;;  %s5067_s2 = inlined_call_operand.vmem [shape: f32[16,8], index: 2, kind: input, shape index: {}]   ;;  %s5068_s3 = inlined_call_operand.vmem [shape: f32[2,8], index: 3, kind: input, shape index: {}]   ;;  %s5069_s4 = inlined_call_operand.vmem [shape: f32[32,96], index: 4, kind: input, shape index: {}]   ;;  %s5070_s5 = inlined_call_operand.vmem [shape: f32[1,96], index: 5, kind: input, shape index: {}]   ;;  %s5071_s6 = inlined_call_operand.vmem [shape: f32[32,32], index: 6, kind: input, shape index: {}]   ;;  %s5072_s7 = inlined_call_operand.vmem [shape: f32[1,32], index: 7, kind: input, shape index: {}]   ;;  %s5073_s8 = inlined_call_operand.vmem [shape: f32[1,32], index: 8, kind: input, shape index: {}]   ;;  %s5074_s9 = inlined_call_operand.vmem [shape: f32[1,32], index: 9, kind: input, shape index: {}]   ;;  %s5075_s10 = inlined_call_operand.vmem [shape: f32[32,32], index: 10, kind: input, shape index: {}]   ;;  %s5076_s11 = inlined_call_operand.vmem [shape: f32[1,32], index: 11, kind: input, shape index: {}]   ;;  %s5077_s12 = inlined_call_operand.vmem [shape: f32[32,64], index: 12, kind: input, shape index: {}]   ;;  %s5078_s13 = inlined_call_operand.vmem [shape: f32[1,64], index: 13, kind: input, shape index: {}]   ;;  %s5079_s14 = inlined_call_operand.vmem [shape: f32[32,32], index: 14, kind: input, shape index: {}]   ;;  %s5080_s15 = inlined_call_operand.vmem [shape: f32[1,32], index: 15, kind: input, shape index: {}]   ;;  %s5081_s16 = inlined_call_operand.vmem [shape: f32[1,32], index: 16, kind: input, shape index: {}]   ;;  %s5082_s17 = inlined_call_operand.vmem [shape: f32[1,32], index: 17, kind: input, shape index: {}]   ;;  %s5083_s18 = inlined_call_operand.vmem [shape: f32[32,64], index: 18, kind: input, shape index: {}]   ;;  %s5084_s19 = inlined_call_operand.vmem [shape: f32[1,64], index: 19, kind: input, shape index: {}]   ;;  %s5085_s20 = inlined_call_operand.vmem [shape: f32[64,32], index: 20, kind: input, shape index: {}]   ;;  %s5086_s21 = inlined_call_operand.vmem [shape: f32[1,32], index: 21, kind: input, shape index: {}]   ;;  %s5087_s22 = inlined_call_operand.vmem [shape: f32[1,32], index: 22, kind: input, shape index: {}]   ;;  %s5088_s23 = inlined_call_operand.vmem [shape: f32[1,32], index: 23, kind: input, shape index: {}]   ;;  %s5089_s24 = inlined_call_operand.vmem [shape: f32[32,128], index: 24, kind: input, shape index: {}]   ;;  %s5090_s25 = inlined_call_operand.vmem [shape: f32[1,128], index: 25, kind: input, shape index: {}]   ;;  %s5091_s26 = inlined_call_operand.vmem [shape: f32[16,128], index: 26, kind: output, shape index: {0}]   ;;  %s5092_s27 = inlined_call_operand.hbm [shape: f32[64,8], index: 27, kind: output, shape index: {1}]  }
   0x1   :  { %5114 = sst [smem:[#allocation6_spill]] %s5065_s0 }
   0x2   :  { %5115 = sst [smem:[#allocation7_spill]] %s5066_s1 }
   0x3   :  { %5116 = sst [smem:[#allocation8_spill]] %s5067_s2 }
   0x4   :  { %5117 = sst [smem:[#allocation9_spill]] %s5068_s3 }
   0x5   :  { %5118 = sst [smem:[#allocation10_spill]] %s5069_s4 }
   0x6   :  { %5119 = sst [smem:[#allocation11_spill]] %s5070_s5 }
   0x7   :  { %5120 = sst [smem:[#allocation12_spill]] %s5071_s6 }
   0x8   :  { %5121 = sst [smem:[#allocation13_spill]] %s5072_s7 }
   0x9   :  { %5122 = sst [smem:[#allocation14_spill]] %s5073_s8 }
   0xa   :  { %5123 = sst [smem:[#allocation15_spill]] %s5074_s9 }
   0xb   :  { %5124 = sst [smem:[#allocation16_spill]] %s5075_s10 }
   0xc   :  { %5125 = sst [smem:[#allocation17_spill]] %s5076_s11 }
   0xd   :  { %s5126_s8 = sld [smem:[#allocation10_spill]]  ;;  %vm101_vm0 = vcmask 261120  }
   0xe   :  { %s5127_s0 = sld [smem:[#allocation6_spill]] }
  0x13   :  { %v93_v0 = vld [vmem:[%s5126_s8 + $0x18] sm:$0xff]  ;;  %v92_v1 = vld [vmem:[%s5126_s8 + $0x10] sm:$0xff]  ;;  %v91_v3 = vld [vmem:[%s5126_s8 + $0x8] sm:$0xff] }
  0x14   :  { %3949 = vmatprep.subr.mxu0 %v93_v0  ;;  %v4488_v2 = vld [vmem:[%s5127_s0] sm:$0xff] }
  0x15   :  { %3950 = vmatpush3.msra.mxu0 %v93_v0  ;;  %3957 = vmatprep.mubr.msk.f32.mxu0 %vm101_vm0, %v4488_v2 }
  0x16   :  { %33 = vsyncpa [#allocation4], 0  ;;  %3951 = vmatprep.subr.mxu0 %v92_v1  ;;  %v90_v4 = vld [vmem:[%s5126_s8] sm:$0xff]  ;;  %v4501_v5 = vld [vmem:[%s5127_s0 + $0x8] sm:$0xff]  ;;  %v4321_v6 = vmov 0.0   ;;  %vm4322_vm1 = vmmov 0  }
  0x17   :  { %3952 = vmatpush3.msra.mxu0 %v92_v1  ;;  %3960 = vmatprep.subr.mxu1 %v4321_v6  ;;  %s5128_s4 = sld [smem:[#allocation11_spill]]  ;;  %s4323_s8 = smov 64   ;;  %vm187_vm2 = vcmask 64512   ;;  %vm523_vm3 = vcmask 130112   ;;  %vm696_vm4 = vcmask 195712   ;;  %vm869_vm5 = vcmask 261312  }
  0x18   :  { %3953 = vmatprep.subr.mxu0 %v91_v3  ;;  %3962 = vmatprep.mubr.msk.f32.mxu1 %vm4322_vm1, %v4321_v6  ;;  %s5104_s30 = smov 96   ;;  %s5106_s9 = smov 88   ;;  %vm3511_vm6 = vcmask 523264  }
  0x19   :  { %3954 = vmatpush3.msra.mxu0 %v91_v3  ;;  %s4326_s5 = smov 120   ;;  %s5100_s28 = smov 80  }
  0x1a   :  { %3955 = vmatprep.subr.mxu0 %v90_v4  ;;  %s4328_s0 = smov 112   ;;  %s5129_s1 = sld [smem:[#allocation8_spill]] }
  0x1b   :  { %3956 = vmatpush3.msra.mxu0 %v90_v4  ;;  %s5102_s6 = smov 72   ;;  %s4330_s11 = smov 104  }
  0x1c   :  { %3958 = vmatmul.mubr.msk.f32.vlgmr.msra.gmra.mxu0 %vm101_vm0, %v4501_v5  ;;  %3980 = vmatprep.subr.mxu0 %v4321_v6  ;;  %s4331_s7 = smov 48   ;;  %s4333_s10 = smov 40  }
  0x1d   :  { %3982 = vmatprep.mubr.msk.f32.mxu0 %vm4322_vm1, %v4321_v6  ;;  %v3753_v7 = vld [vmem:[%s5128_s4] ss:$0 sm:$0xff]  ;;  %s4332_s4 = smov 56   ;;  %s5110_s29 = smov 16  }
  0x1e   :  { %s5135_s3 = sld [smem:[#allocation15_spill]]  ;;  %s5142_s2 = smov 8  }
  0x20   :  { %v4549_v19 = vld [vmem:[%s5129_s1] sm:$0xff]  ;;  %v871_v61 = vld [vmem:[%s5129_s1 + $0x8] sm:$0xff]  ;;  %s5108_s1 = smov 24  }
  0xdc   :  { %v3959_v8 = vpop.f32.mrf.mxu0 }
  0xdd   :  { %v4514_v9 = vadd.f32 %v3959_v8, %v3753_v7 }
  0xde   :  { %v174_v10 = vpop.f32.mrf.mxu0 }
  0xdf   :  { %v4516_v11 = vadd.f32 %v3753_v7, %v174_v10 }
  0xe1   :  { %275 = vrot.lane.b32.xlu1 %v4516_v11, %s4323_s8  ;;  %185 = vrot.lane.b32.xlu0 %v4516_v11, %s5104_s30 }
  0xe5   :  { %354 = vrot.lane.b32.xlu1 %v4516_v11, %s5106_s9 }
  0xe9   :  { %352 = vrot.lane.b32.xlu1 %v4516_v11, %s4326_s5 }
  0xed   :  { %527 = vrot.lane.b32.xlu1 %v4516_v11, %s5100_s28 }
  0xf1   :  { %525 = vrot.lane.b32.xlu1 %v4516_v11, %s4328_s0 }
 0x153   :  { %v276_v12 = vpop.permute.xlu1 %275  ;;  %v186_v13 = vpop.permute.xlu0 %185 }
 0x154   :  { %3961 = vmatpush3.xpose.msk.msra.mxu1 %vm187_vm2, %v186_v13 }
 0x155   :  { %3965 = vmatprep.subr.mxu1 %v4321_v6 }
 0x157   :  { %v4532_v14 = vpop.permute.xlu1 %354  ;;  %3963 = vmatmul.mubr.msk.f32.vlgmr.msra.gmra.mxu1 %vm187_vm2, %v4516_v11 }
 0x158   :  { %3966 = vmatpush3.msra.mxu1 %v276_v12  ;;  %3967 = vmatprep.mubr.msk.f32.mxu1 %vm4322_vm1, %v4321_v6 }
 0x159   :  { %3970 = vmatprep.subr.mxu1 %v4321_v6 }
 0x15b   :  { %v4539_v15 = vpop.permute.xlu1 %352 }
 0x15f   :  { %v528_v16 = vpop.permute.xlu1 %527 }
 0x160   :  { %3981 = vmatpush3.xpose.msk.msra.mxu0 %vm187_vm2, %v528_v16 }
 0x161   :  { %3990 = vmatprep.subr.mxu0 %v4321_v6 }
 0x163   :  { %v526_v17 = vpop.permute.xlu1 %525 }
 0x164   :  { %3983 = vmatmul.mubr.msk.f32.vlgmr.msra.gmra.mxu0 %vm187_vm2, %v526_v17 }
 0x165   :  { %3992 = vmatprep.mubr.msk.f32.mxu0 %vm4322_vm1, %v4321_v6 }
 0x217   :  { %v258_v18 = vpop.f32.mrf.mxu1 }
 0x218   :  { %v262_v20 = vmul.f32 0.35355338, %v258_v18 }
 0x219   :  { %v3964_v21 = vpop.f32.mrf.mxu1 }
 0x21a   :  { %v263_v22 = vadd.f32 %v262_v20, %v4549_v19 }
 0x21c   :  { %v264_v23 = vsel %vm187_vm2, %v263_v22, -inf }
 0x21d   :  { %265 = vmax.xlane.f32.xlu0 %v264_v23 }
 0x224   :  { %v599_v24 = vpop.f32.mrf.mxu0 }
 0x225   :  { %v603_v26 = vmul.f32 0.35355338, %v599_v24 }
 0x226   :  { %v3984_v25 = vpop.f32.mrf.mxu0 }
 0x227   :  { %v4560_v27 = vadd.f32 %v603_v26, %v4549_v19 }
 0x229   :  { %v605_v28 = vsel %vm187_vm2, %v4560_v27, -inf }
 0x233   :  { %700 = vrot.lane.b32.xlu0 %v4516_v11, %s5102_s6 }
 0x237   :  { %1211 = vrot.lane.b32.xlu0 %v4514_v9, %s4328_s0 }
 0x23b   :  { %1383 = vrot.lane.b32.xlu0 %v4514_v9, %s4330_s11 }
 0x25a   :  { %606 = vmax.xlane.f32.xlu0 %v605_v28 }
 0x2a6   :  { %v266_v29 = vpop.xlane.xlu0 %265 }
 0x2a7   :  { %v267_v30 = vsub.f32 %v263_v22, %v266_v29 }
 0x2a9   :  { %v268_v31 = vmul.f32 1.442695, %v267_v30 }
 0x2aa   :  { %v701_v32 = vpop.permute.xlu0 %700 }
 0x2ab   :  { %4223 = vpow2.f32 %v268_v31  ;;  %3991 = vmatpush3.xpose.msk.msra.mxu0 %vm187_vm2, %v701_v32 }
 0x2ac   :  { %4000 = vmatprep.subr.mxu0 %v4321_v6 }
 0x2ae   :  { %v1212_v43 = vpop.permute.xlu0 %1211 }
 0x2b2   :  { %v1384_v45 = vpop.permute.xlu0 %1383 }
 0x2b8   :  { %v4224_v33 = vpop.eup %4223 }
 0x2b9   :  { %v270_v34 = vsel %vm187_vm2, %v4224_v33, 0.0 }
 0x2ba   :  { %271 = vadd.xlane.f32.xlu1 %v270_v34 }
 0x2cb   :  { %698 = vrot.lane.b32.xlu1 %v4516_v11, %s4330_s11 }
 0x2cf   :  { %873 = vrot.lane.b32.xlu1 %v4514_v9, %s5104_s30  ;;  %s5132_s30 = sld [smem:[#allocation7_spill]] }
 0x2d3   :  { %1041 = vrot.lane.b32.xlu1 %v4514_v9, %s5106_s9  ;;  %s5140_s9 = smov 72  }
 0x2d7   :  { %1039 = vrot.lane.b32.xlu1 %v4514_v9, %s4326_s5 }
 0x2db   :  { %1213 = vrot.lane.b32.xlu1 %v4514_v9, %s5100_s28  ;;  %s5131_s28 = sld [smem:[#allocation13_spill]] }
 0x2df   :  { %1385 = vrot.lane.b32.xlu1 %v4514_v9, %s5102_s6  ;;  %s5133_s6 = sld [smem:[#allocation16_spill]] }
 0x2e3   :  { %v607_v50 = vpop.xlane.xlu0 %606 }
 0x2e4   :  { %v608_v53 = vsub.f32 %v4560_v27, %v607_v50 }
 0x2e6   :  { %v609_v55 = vmul.f32 1.442695, %v608_v53 }
 0x343   :  { %v272_v35 = vpop.xlane.xlu1 %271 }
 0x344   :  { %4225 = vrcp.f32 %v272_v35 }
 0x345   :  { %4227 = vpow2.f32 %v609_v55 }
 0x347   :  { %v699_v36 = vpop.permute.xlu1 %698 }
 0x348   :  { %3993 = vmatmul.mubr.msk.f32.vlgmr.msra.gmra.mxu0 %vm187_vm2, %v699_v36 }
 0x349   :  { %4002 = vmatprep.mubr.msk.f32.mxu0 %vm4322_vm1, %v4321_v6 }
 0x34b   :  { %v874_v37 = vpop.permute.xlu1 %873 }
 0x34c   :  { %4001 = vmatpush3.xpose.msk.msra.mxu0 %vm187_vm2, %v874_v37 }
 0x34d   :  { %4010 = vmatprep.subr.mxu0 %v4321_v6 }
 0x34f   :  { %v1042_v38 = vpop.permute.xlu1 %1041  ;;  %4003 = vmatmul.mubr.msk.f32.vlgmr.msra.gmra.mxu0 %vm187_vm2, %v4514_v9 }
 0x350   :  { %4011 = vmatpush3.xpose.msk.msra.mxu0 %vm187_vm2, %v1042_v38  ;;  %4012 = vmatprep.mubr.msk.f32.mxu0 %vm4322_vm1, %v4321_v6 }
 0x351   :  { %v4226_v39 = vpop.eup %4225  ;;  %4020 = vmatprep.subr.mxu0 %v4321_v6 }
 0x352   :  { %v274_v40 = vmul.f32 %v4226_v39, %v4224_v33  ;;  %v4625_v23 = vpop.eup %4227 }
 0x353   :  { %v1040_v41 = vpop.permute.xlu1 %1039  ;;  %v611_v24 = vsel %vm187_vm2, %v4625_v23, 0.0 }
 0x354   :  { %3968 = vmatmul.mubr.msk.f32.vlgmr.msra.gmra.mxu1 %vm187_vm2, %v274_v40  ;;  %4013 = vmatmul.mubr.msk.f32.vlgmr.msra.gmra.mxu0 %vm187_vm2, %v1040_v41 }
 0x355   :  { %3971 = vmatpush3.xpose.msk.msra.mxu1 %vm187_vm2, %v4532_v14  ;;  %3972 = vmatprep.mubr.msk.f32.mxu1 %vm4322_vm1, %v4321_v6 }
 0x356   :  { %4022 = vmatprep.mubr.msk.f32.mxu0 %vm4322_vm1, %v4321_v6  ;;  %3975 = vmatprep.subr.mxu1 %v4321_v6 }
 0x357   :  { %v1214_v42 = vpop.permute.xlu1 %1213 }
 0x358   :  { %3973 = vmatmul.mubr.msk.f32.vlgmr.msra.gmra.mxu1 %vm187_vm2, %v4539_v15  ;;  %4021 = vmatpush3.xpose.msk.msra.mxu0 %vm187_vm2, %v1214_v42 }
 0x359   :  { %4030 = vmatprep.subr.mxu0 %v4321_v6  ;;  %3977 = vmatprep.mubr.msk.f32.mxu1 %vm4322_vm1, %v4321_v6 }
 0x35b   :  { %v1386_v44 = vpop.permute.xlu1 %1385  ;;  %4023 = vmatmul.mubr.msk.f32.vlgmr.msra.gmra.mxu0 %vm187_vm2, %v1212_v43 }
 0x35c   :  { %4031 = vmatpush3.xpose.msk.msra.mxu0 %vm187_vm2, %v1386_v44  ;;  %4032 = vmatprep.mubr.msk.f32.mxu0 %vm4322_vm1, %v4321_v6 }
 0x35f   :  { %4033 = vmatmul.mubr.msk.f32.vlgmr.msra.gmra.mxu0 %vm187_vm2, %v1384_v45 }
 0x408   :  { %v772_v46 = vpop.f32.mrf.mxu0 }
 0x409   :  { %v776_v47 = vmul.f32 0.35355338, %v772_v46 }
 0x40a   :  { %v3994_v48 = vpop.f32.mrf.mxu0 }
 0x40b   :  { %v777_v49 = vadd.f32 %v776_v47, %v4549_v19 }
 0x40d   :  { %v778_v51 = vsel %vm187_vm2, %v777_v49, -inf }
 0x40e   :  { %779 = vmax.xlane.f32.xlu0 %v778_v51 }
 0x40f   :  { %v945_v52 = vpop.f32.mrf.mxu0 }
 0x410   :  { %v949_v0 = vmul.f32 0.35355338, %v945_v52 }
 0x411   :  { %v4004_v54 = vpop.f32.mrf.mxu0 }
 0x412   :  { %v950_v14 = vadd.f32 %v949_v0, %v871_v61 }
 0x414   :  { %v347_v56 = vpop.f32.mrf.mxu1  ;;  %v1113_v57 = vpop.f32.mrf.mxu0  ;;  %v951_v18 = vsel %vm187_vm2, %v950_v14, -inf }
 0x415   :  { %351 = vst.msk [vmem:[#allocation2] sm:$0xff] %vm187_vm2, %v347_v56  ;;  %v1117_v58 = vmul.f32 0.35355338, %v1113_v57 }
 0x416   :  { %v3969_v59 = vpop.f32.mrf.mxu1  ;;  %v4014_v60 = vpop.f32.mrf.mxu0 }
 0x417   :  { %v1118_v62 = vadd.f32 %v1117_v58, %v871_v61 }
 0x418   :  { %v426_v63 = vpop.f32.mrf.mxu1 }
 0x419   :  { %v430_v1 = vmul.f32 0.35355338, %v426_v63  ;;  %v1119_v3 = vsel %vm187_vm2, %v1118_v62, -inf }
 0x41a   :  { %1120 = vmax.xlane.f32.xlu0 %v1119_v3  ;;  %v3974_v4 = vpop.f32.mrf.mxu1 }
 0x41b   :  { %v1285_v7 = vpop.f32.mrf.mxu0  ;;  %v4619_v8 = vadd.f32 %v430_v1, %v4549_v19 }
 0x41c   :  { %v1289_v10 = vmul.f32 0.35355338, %v1285_v7 }
 0x41d   :  { %v4024_v12 = vpop.f32.mrf.mxu0  ;;  %v432_v13 = vsel %vm187_vm2, %v4619_v8, -inf }
 0x41e   :  { %433 = vmax.xlane.f32.xlu1 %v432_v13  ;;  %v1290_v20 = vadd.f32 %v1289_v10, %v871_v61 }
 0x41f   :  { %v1457_v15 = vpop.f32.mrf.mxu0 }
 0x420   :  { %v1461_v16 = vmul.f32 0.35355338, %v1457_v15  ;;  %v1291_v19 = vsel %vm187_vm2, %v1290_v20, -inf }
 0x421   :  { %v4034_v17 = vpop.f32.mrf.mxu0 }
 0x422   :  { %952 = vmax.xlane.f32.xlu1 %v951_v18  ;;  %v1462_v21 = vadd.f32 %v1461_v16, %v871_v61 }
 0x424   :  { %v1463_v22 = vsel %vm187_vm2, %v1462_v21, -inf }
 0x425   :  { %1464 = vmax.xlane.f32.xlu0 %v1463_v22 }
 0x426   :  { %1292 = vmax.xlane.f32.xlu1 %v1291_v19 }
 0x429   :  { %612 = vadd.xlane.f32.xlu0 %v611_v24 }
 0x497   :  { %v780_v25 = vpop.xlane.xlu0 %779 }
 0x498   :  { %v781_v26 = vsub.f32 %v777_v49, %v780_v25 }
 0x49a   :  { %v782_v27 = vmul.f32 1.442695, %v781_v26 }
 0x49c   :  { %4229 = vpow2.f32 %v782_v27 }
 0x4a3   :  { %v1121_v28 = vpop.xlane.xlu0 %1120 }
 0x4a4   :  { %v1122_v29 = vsub.f32 %v1118_v62, %v1121_v28 }
 0x4a6   :  { %v1123_v30 = vmul.f32 1.442695, %v1122_v29 }
 0x4a7   :  { %v434_v31 = vpop.xlane.xlu1 %433 }
 0x4a8   :  { %4231 = vpow2.f32 %v1123_v30  ;;  %v435_v51 = vsub.f32 %v4619_v8, %v434_v31 }
 0x4a9   :  { %v4630_v32 = vpop.eup %4229 }
 0x4aa   :  { %v784_v33 = vsel %vm187_vm2, %v4630_v32, 0.0  ;;  %v436_v52 = vmul.f32 1.442695, %v435_v51 }
 0x4ab   :  { %785 = vadd.xlane.f32.xlu1 %v784_v33  ;;  %v953_v34 = vpop.xlane.xlu1 %952 }
 0x4ac   :  { %v954_v35 = vsub.f32 %v950_v14, %v953_v34 }
 0x4ae   :  { %v955_v36 = vmul.f32 1.442695, %v954_v35  ;;  %v1465_v37 = vpop.xlane.xlu0 %1464 }
 0x4af   :  { %v1466_v38 = vsub.f32 %v1462_v21, %v1465_v37  ;;  %v1293_v39 = vpop.xlane.xlu1 %1292 }
 0x4b0   :  { %4233 = vpow2.f32 %v955_v36  ;;  %v1294_v40 = vsub.f32 %v1290_v20, %v1293_v39 }
 0x4b1   :  { %v1467_v41 = vmul.f32 1.442695, %v1466_v38 }
 0x4b2   :  { %v1295_v42 = vmul.f32 1.442695, %v1294_v40  ;;  %v613_v55 = vpop.xlane.xlu0 %612 }
 0x4b3   :  { %4235 = vpow2.f32 %v1467_v41 }
 0x4b4   :  { %4237 = vpow2.f32 %v1295_v42 }
 0x4b5   :  { %v4634_v43 = vpop.eup %4231  ;;  %4239 = vpow2.f32 %v436_v52 }
 0x4b6   :  { %v1125_v44 = vsel %vm187_vm2, %v4634_v43, 0.0 }
 0x4b7   :  { %1126 = vadd.xlane.f32.xlu1 %v1125_v44 }
 0x4bd   :  { %v4638_v45 = vpop.eup %4233 }
 0x4be   :  { %v957_v46 = vsel %vm187_vm2, %v4638_v45, 0.0 }
 0x4bf   :  { %958 = vadd.xlane.f32.xlu0 %v957_v46 }
 0x4c0   :  { %v4642_v47 = vpop.eup %4235 }
 0x4c1   :  { %v4644_v48 = vpop.eup %4237  ;;  %v1469_v49 = vsel %vm187_vm2, %v4642_v47, 0.0 }
 0x4c2   :  { %1470 = vadd.xlane.f32.xlu1 %v1469_v49  ;;  %v1297_v50 = vsel %vm187_vm2, %v4644_v48, 0.0  ;;  %v4240_v53 = vpop.eup %4239 }
 0x4c3   :  { %1298 = vadd.xlane.f32.xlu0 %v1297_v50  ;;  %v438_v54 = vsel %vm187_vm2, %v4240_v53, 0.0 }
 0x4d3   :  { %616 = vrot.lane.b32.xlu1 %v4516_v11, %s4331_s7 }
 0x4d9   :  { %443 = vrot.lane.b32.xlu0 %v4516_v11, %s4332_s4 }
 0x4dd   :  { %962 = vrot.lane.b32.xlu0 %v4514_v9, %s4323_s8  ;;  %s5112_s8 = smov 8  }
 0x4e1   :  { %1302 = vrot.lane.b32.xlu0 %v4514_v9, %s4331_s7  ;;  %s5130_s7 = sld [smem:[#allocation12_spill]] }
 0x4e7   :  { %v1560_v29 = vld [vmem:[%s5130_s7 + $0x18] sm:$0xff]  ;;  %v1559_v30 = vld [vmem:[%s5130_s7 + $0x10] sm:$0xff]  ;;  %v1557_v34 = vld [vmem:[%s5130_s7] sm:$0xff] }
 0x4e8   :  { %4040 = vmatprep.subr.mxu0 %v1560_v29 }
 0x4e9   :  { %4041 = vmatpush3.msra.mxu0 %v1560_v29 }
 0x4ea   :  { %4042 = vmatprep.subr.mxu0 %v1559_v30 }
 0x4eb   :  { %4043 = vmatpush3.msra.mxu0 %v1559_v30 }
 0x4f7   :  { %439 = vadd.xlane.f32.xlu1 %v438_v54 }
 0x508   :  { %789 = vrot.lane.b32.xlu1 %v4516_v11, %s4333_s10 }
 0x50c   :  { %1130 = vrot.lane.b32.xlu1 %v4514_v9, %s4332_s4 }
 0x510   :  { %1474 = vrot.lane.b32.xlu1 %v4514_v9, %s4333_s10 }
 0x534   :  { %v786_v59 = vpop.xlane.xlu1 %785 }
 0x540   :  { %v1127_v60 = vpop.xlane.xlu1 %1126 }
 0x548   :  { %v959_v56 = vpop.xlane.xlu0 %958 }
 0x54b   :  { %v1471_v61 = vpop.xlane.xlu1 %1470 }
 0x54c   :  { %v1299_v57 = vpop.xlane.xlu0 %1298 }
 0x54f   :  { %v617_v62 = vpop.permute.xlu1 %616 }
 0x550   :  { %v444_v58 = vpop.permute.xlu0 %443 }
 0x551   :  { %3976 = vmatpush3.msra.mxu1 %v444_v58 }
 0x552   :  { %3985 = vmatprep.subr.mxu1 %v4321_v6 }
 0x554   :  { %v963_v10 = vpop.permute.xlu0 %962 }
 0x558   :  { %v1303_v17 = vpop.permute.xlu0 %1302 }
 0x580   :  { %v440_v63 = vpop.xlane.xlu1 %439 }
 0x581   :  { %4241 = vrcp.f32 %v440_v63 }
 0x582   :  { %4243 = vrcp.f32 %v613_v55 }
 0x583   :  { %4245 = vrcp.f32 %v786_v59 }
 0x584   :  { %4247 = vrcp.f32 %v959_v56  ;;  %v790_v4 = vpop.permute.xlu1 %789 }
 0x585   :  { %4249 = vrcp.f32 %v1127_v60 }
 0x586   :  { %4251 = vrcp.f32 %v1299_v57 }
 0x587   :  { %4253 = vrcp.f32 %v1471_v61 }
 0x588   :  { %v1131_v14 = vpop.permute.xlu1 %1130 }
 0x58c   :  { %v1475_v21 = vpop.permute.xlu1 %1474 }
 0x58e   :  { %v4242_v11 = vpop.eup %4241 }
 0x58f   :  { %v442_v0 = vmul.f32 %v4242_v11, %v4240_v53  ;;  %v4244_v9 = vpop.eup %4243 }
 0x590   :  { %v615_v1 = vmul.f32 %v4244_v9, %v4625_v23  ;;  %v4246_v3 = vpop.eup %4245  ;;  %v1790_v9 = vld [vmem:[%s5077_s12 + $0x10] sm:$0xff] }
 0x591   :  { %3978 = vmatmul.mubr.msk.f32.vlgmr.msra.gmra.mxu1 %vm187_vm2, %v442_v0  ;;  %v788_v7 = vmul.f32 %v4246_v3, %v4630_v32  ;;  %v4248_v8 = vpop.eup %4247  ;;  %v1558_v32 = vld [vmem:[%s5130_s7 + $0x8] sm:$0xff] }
 0x592   :  { %3986 = vmatpush3.msra.mxu1 %v617_v62  ;;  %3987 = vmatprep.mubr.msk.f32.mxu1 %vm4322_vm1, %v4321_v6  ;;  %v961_v12 = vmul.f32 %v4248_v8, %v4638_v45  ;;  %v4250_v13 = vpop.eup %4249  ;;  %v1789_v3 = vld [vmem:[%s5077_s12 + $0x8] sm:$0xff]  ;;  %v1788_v8 = vld [vmem:[%s5077_s12] sm:$0xff] }
 0x593   :  { %3995 = vmatprep.subr.mxu1 %v4321_v6  ;;  %v1129_v15 = vmul.f32 %v4250_v13, %v4634_v43  ;;  %v4252_v16 = vpop.eup %4251  ;;  %4044 = vmatprep.subr.mxu0 %v1558_v32  ;;  %v1696_v13 = vld [vmem:[%s5133_s6] sm:$0xff] }
 0x594   :  { %v1301_v18 = vmul.f32 %v4252_v16, %v4644_v48  ;;  %v4254_v20 = vpop.eup %4253  ;;  %4045 = vmatpush3.msra.mxu0 %v1558_v32  ;;  %v3780_v48 = vld [vmem:[%s5131_s28] ss:$0 sm:$0xff]  ;;  %s5134_s28 = sld [smem:[#allocation14_spill]] }
 0x595   :  { %3988 = vmatmul.mubr.msk.f32.vlgmr.msra.gmra.mxu1 %vm187_vm2, %v615_v1  ;;  %v1473_v22 = vmul.f32 %v4254_v20, %v4642_v47  ;;  %4046 = vmatprep.subr.mxu0 %v1557_v34  ;;  %v88_v1 = vld [vmem:[%s5132_s30] sm:$0xff] }
 0x596   :  { %3996 = vmatpush3.msra.mxu1 %v790_v4  ;;  %3997 = vmatprep.mubr.msk.f32.mxu1 %vm4322_vm1, %v4321_v6  ;;  %v1699_v4 = vld [vmem:[%s5133_s6 + $0x18] sm:$0xff] }
 0x597   :  { %4005 = vmatprep.subr.mxu1 %v4321_v6  ;;  %4047 = vmatpush3.msra.mxu0 %v1557_v34 }
 0x599   :  { %3998 = vmatmul.mubr.msk.f32.vlgmr.msra.gmra.mxu1 %vm187_vm2, %v788_v7  ;;  %v1698_v7 = vld [vmem:[%s5133_s6 + $0x10] sm:$0xff] }
 0x59a   :  { %4006 = vmatpush3.msra.mxu1 %v963_v10  ;;  %4007 = vmatprep.mubr.msk.f32.mxu1 %vm4322_vm1, %v4321_v6  ;;  %v1697_v10 = vld [vmem:[%s5133_s6 + $0x8] sm:$0xff]  ;;  %s5143_s6 = smov 16  }
 0x59b   :  { %4015 = vmatprep.subr.mxu1 %v4321_v6 }
 0x59d   :  { %4008 = vmatmul.mubr.msk.f32.vlgmr.msra.gmra.mxu1 %vm187_vm2, %v961_v12  ;;  %v89_v12 = vld [vmem:[%s5132_s30 + $0x8] sm:$0xff] }
 0x59e   :  { %4016 = vmatpush3.msra.mxu1 %v1131_v14  ;;  %4017 = vmatprep.mubr.msk.f32.mxu1 %vm4322_vm1, %v4321_v6 }
 0x59f   :  { %4025 = vmatprep.subr.mxu1 %v4321_v6 }
 0x5a1   :  { %4018 = vmatmul.mubr.msk.f32.vlgmr.msra.gmra.mxu1 %vm187_vm2, %v1129_v15 }
 0x5a2   :  { %4026 = vmatpush3.msra.mxu1 %v1303_v17  ;;  %4027 = vmatprep.mubr.msk.f32.mxu1 %vm4322_vm1, %v4321_v6 }
 0x5a3   :  { %4035 = vmatprep.subr.mxu1 %v4321_v6 }
 0x5a5   :  { %4028 = vmatmul.mubr.msk.f32.vlgmr.msra.gmra.mxu1 %vm187_vm2, %v1301_v18 }
 0x5a6   :  { %4036 = vmatpush3.msra.mxu1 %v1475_v21  ;;  %4037 = vmatprep.mubr.msk.f32.mxu1 %vm4322_vm1, %v4321_v6 }
 0x5a7   :  { %4051 = vmatprep.subr.mxu1 %v1699_v4 }
 0x5a9   :  { %4038 = vmatmul.mubr.msk.f32.vlgmr.msra.gmra.mxu1 %vm187_vm2, %v1473_v22  ;;  %v3783_v22 = vld [vmem:[%s5134_s28] ss:$0 sm:$0xff]  ;;  %s5141_s28 = smov 80  }
 0x5aa   :  { %4052 = vmatpush3.msra.mxu1 %v1699_v4 }
 0x5ab   :  { %4053 = vmatprep.subr.mxu1 %v1698_v7 }
 0x5ac   :  { %4054 = vmatpush3.msra.mxu1 %v1698_v7 }
 0x5ad   :  { %4055 = vmatprep.subr.mxu1 %v1697_v10 }
 0x5ae   :  { %4056 = vmatpush3.msra.mxu1 %v1697_v10 }
 0x5af   :  { %4057 = vmatprep.subr.mxu1 %v1696_v13 }
 0x5b0   :  { %4058 = vmatpush3.msra.mxu1 %v1696_v13 }
 0x5b1   :  { %4073 = vmatprep.subr.mxu1 %v4321_v6 }
 0x651   :  { %v515_v23 = vpop.f32.mrf.mxu1 }
 0x652   :  { %520 = vrot.lane.b32.xlu0 %v515_v23, %s5112_s8 }
 0x653   :  { %v3979_v19 = vpop.f32.mrf.mxu1 }
 0x654   :  { %v3784_v19 = vld [vmem:[%s5135_s3] ss:$0 sm:$0xff]  ;;  %s5144_s3 = smov 24  }
 0x655   :  { %v688_v24 = vpop.f32.mrf.mxu1 }
 0x656   :  { %693 = vrot.lane.b32.xlu1 %v688_v24, %s5110_s29 }
 0x657   :  { %v3989_v25 = vpop.f32.mrf.mxu1 }
 0x659   :  { %v861_v26 = vpop.f32.mrf.mxu1 }
 0x65a   :  { %866 = vrot.lane.b32.xlu1 %v861_v26, %s5108_s1 }
 0x65b   :  { %v3999_v27 = vpop.f32.mrf.mxu1 }
 0x65d   :  { %v1034_v28 = vpop.f32.mrf.mxu1 }
 0x65e   :  { %1038 = vst.msk [vmem:[#allocation2 + $0x8] sm:$0xff] %vm187_vm2, %v1034_v28 }
 0x65f   :  { %v4009_v31 = vpop.f32.mrf.mxu1 }
 0x660   :  { %v3788_v31 = vld [vmem:[%s5078_s13] ss:$0 sm:$0xff] }
 0x661   :  { %v1202_v33 = vpop.f32.mrf.mxu1 }
 0x662   :  { %1207 = vrot.lane.b32.xlu0 %v1202_v33, %s5112_s8 }
 0x663   :  { %v4019_v35 = vpop.f32.mrf.mxu1 }
 0x665   :  { %v1374_v36 = vpop.f32.mrf.mxu1 }
 0x666   :  { %1379 = vrot.lane.b32.xlu0 %v1374_v36, %s5110_s29  ;;  %s5136_s29 = sld [smem:[#allocation17_spill]] }
 0x667   :  { %v4029_v37 = vpop.f32.mrf.mxu1 }
 0x669   :  { %v1546_v38 = vpop.f32.mrf.mxu1 }
 0x66a   :  { %1551 = vrot.lane.b32.xlu1 %v1546_v38, %s5108_s1  ;;  %s5137_s1 = smov 88  }
 0x66b   :  { %v4039_v39 = vpop.f32.mrf.mxu1 }
 0x66c   :  { %v3785_v37 = vld [vmem:[%s5136_s29] ss:$0 sm:$0xff] }
 0x6c4   :  { %v521_v40 = vpop.permute.xlu0 %520 }
 0x6c5   :  { %524 = vst.msk [vmem:[#allocation2] sm:$0xff] %vm523_vm3, %v521_v40 }
 0x6c8   :  { %v694_v41 = vpop.permute.xlu1 %693 }
 0x6c9   :  { %697 = vst.msk [vmem:[#allocation2] sm:$0xff] %vm696_vm4, %v694_v41 }
 0x6cc   :  { %v867_v42 = vpop.permute.xlu1 %866 }
 0x6cd   :  { %870 = vst.msk [vmem:[#allocation2] sm:$0xff] %vm869_vm5, %v867_v42 }
 0x6d4   :  { %v1208_v43 = vpop.permute.xlu0 %1207  ;;  %v1555_v44 = vld [vmem:[#allocation2] sm:$0xff] }
 0x6d5   :  { %1210 = vst.msk [vmem:[#allocation2 + $0x8] sm:$0xff] %vm523_vm3, %v1208_v43  ;;  %4048 = vmatprep.mubr.msk.f32.mxu0 %vm101_vm0, %v1555_v44 }
 0x6d8   :  { %v1380_v45 = vpop.permute.xlu0 %1379 }
 0x6d9   :  { %1382 = vst.msk [vmem:[#allocation2 + $0x8] sm:$0xff] %vm696_vm4, %v1380_v45 }
 0x6dc   :  { %v1552_v46 = vpop.permute.xlu1 %1551 }
 0x6dd   :  { %1554 = vst.msk [vmem:[#allocation2 + $0x8] sm:$0xff] %vm869_vm5, %v1552_v46 }
 0x6e4   :  { %v1556_v47 = vld [vmem:[#allocation2 + $0x8] sm:$0xff] }
 0x6e5   :  { %4049 = vmatmul.mubr.msk.f32.vlgmr.msra.gmra.mxu0 %vm101_vm0, %v1556_v47 }
 0x6e6   :  { %4070 = vmatprep.mubr.msk.f32.mxu0 %vm101_vm0, %v88_v1 }
 0x7a5   :  { %v4050_v49 = vpop.f32.mrf.mxu0 }
 0x7a6   :  { %v1646_v50 = vadd.f32 %v4050_v49, %v3780_v48 }
 0x7a7   :  { %v1640_v51 = vpop.f32.mrf.mxu0 }
 0x7a8   :  { %v1641_v52 = vadd.f32 %v3780_v48, %v1640_v51  ;;  %v1650_v53 = vadd.f32 %v1646_v50, %v4501_v5 }
 0x7aa   :  { %v1656_v54 = vsel %vm101_vm0, %v1650_v53, 0.0  ;;  %v1649_v55 = vadd.f32 %v1641_v52, %v4488_v2  ;;  %v1791_v2 = vld [vmem:[%s5077_s12 + $0x18] sm:$0xff]  ;;  %s5138_s12 = smov 96  }
 0x7ab   :  { %1657 = vadd.xlane.f32.xlu1 %v1656_v54  ;;  %4062 = vmatprep.subr.mxu0 %v1791_v2 }
 0x7ac   :  { %v1653_v56 = vsel %vm101_vm0, %v1649_v55, 0.0  ;;  %4063 = vmatpush3.msra.mxu0 %v1791_v2 }
 0x7ad   :  { %1654 = vadd.xlane.f32.xlu0 %v1653_v56  ;;  %4064 = vmatprep.subr.mxu0 %v1790_v9 }
 0x7ae   :  { %4065 = vmatpush3.msra.mxu0 %v1790_v9 }
 0x7af   :  { %4066 = vmatprep.subr.mxu0 %v1789_v3 }
 0x7b0   :  { %4067 = vmatpush3.msra.mxu0 %v1789_v3 }
 0x7b1   :  { %4068 = vmatprep.subr.mxu0 %v1788_v8 }
 0x7b2   :  { %4069 = vmatpush3.msra.mxu0 %v1788_v8 }
 0x7b3   :  { %4071 = vmatmul.mubr.msk.f32.vlgmr.msra.gmra.mxu0 %vm101_vm0, %v89_v12  ;;  %4083 = vmatprep.subr.mxu0 %v4321_v6 }
 0x7b4   :  { %4085 = vmatprep.mubr.msk.f32.mxu0 %vm4322_vm1, %v4321_v6 }
 0x834   :  { %v1658_v57 = vpop.xlane.xlu1 %1657 }
 0x835   :  { %v1661_v58 = vmul.f32 0.03125, %v1658_v57 }
 0x836   :  { %v1655_v59 = vpop.xlane.xlu0 %1654 }
 0x837   :  { %v1660_v60 = vmul.f32 0.03125, %v1655_v59  ;;  %v1663_v61 = vsub.f32 %v1650_v53, %v1661_v58 }
 0x839   :  { %v1662_v62 = vsub.f32 %v1649_v55, %v1660_v60  ;;  %v1665_v0 = vmul.f32 %v1663_v61, %v1663_v61 }
 0x83b   :  { %v1664_v63 = vmul.f32 %v1662_v62, %v1662_v62  ;;  %v1669_v5 = vsel %vm101_vm0, %v1665_v0, 0.0 }
 0x83d   :  { %v1666_v11 = vsel %vm101_vm0, %v1664_v63, 0.0 }
 0x83e   :  { %1667 = vadd.xlane.f32.xlu0 %v1666_v11 }
 0x842   :  { %1670 = vadd.xlane.f32.xlu0 %v1669_v5 }
 0x873   :  { %v4072_v30 = vpop.f32.mrf.mxu0 }
 0x874   :  { %v4782_v32 = vadd.f32 %v4072_v30, %v3788_v31 }
 0x875   :  { %v1871_v33 = vpop.f32.mrf.mxu0 }
 0x876   :  { %v4784_v34 = vadd.f32 %v3788_v31, %v1871_v33 }
 0x878   :  { %2054 = vrot.lane.b32.xlu1 %v4784_v34, %s4326_s5 }
 0x87c   :  { %2227 = vrot.lane.b32.xlu1 %v4784_v34, %s4328_s0 }
 0x8c7   :  { %v1668_v14 = vpop.xlane.xlu0 %1667 }
 0x8c8   :  { %v1672_v15 = vmul.f32 0.03125, %v1668_v14 }
 0x8ca   :  { %v1674_v16 = vadd.f32 1e-05, %v1672_v15 }
 0x8cb   :  { %v1671_v17 = vpop.xlane.xlu0 %1670 }
 0x8cc   :  { %4255 = vrsqrt.f32 %v1674_v16  ;;  %v1673_v18 = vmul.f32 0.03125, %v1671_v17 }
 0x8ce   :  { %v1675_v20 = vadd.f32 1e-05, %v1673_v18 }
 0x8d0   :  { %4257 = vrsqrt.f32 %v1675_v20 }
 0x8d9   :  { %v4256_v21 = vpop.eup %4255 }
 0x8da   :  { %v1678_v23 = vmul.f32 %v4256_v21, %v1662_v62 }
 0x8dc   :  { %v1686_v24 = vmul.f32 %v3783_v22, %v1678_v23 }
 0x8dd   :  { %v4258_v25 = vpop.eup %4257 }
 0x8de   :  { %v1679_v26 = vmul.f32 %v4258_v25, %v1663_v61  ;;  %v4769_v27 = vadd.f32 %v3784_v19, %v1686_v24 }
 0x8e0   :  { %v1687_v28 = vmul.f32 %v3783_v22, %v1679_v26  ;;  %4059 = vmatprep.mubr.msk.f32.mxu1 %vm101_vm0, %v4769_v27 }
 0x8e2   :  { %v4773_v29 = vadd.f32 %v3784_v19, %v1687_v28 }
 0x8e4   :  { %4060 = vmatmul.mubr.msk.f32.vlgmr.msra.gmra.mxu1 %vm101_vm0, %v4773_v29 }
 0x8e5   :  { %4075 = vmatprep.mubr.msk.f32.mxu1 %vm4322_vm1, %v4321_v6  ;;  %4074 = vmatpush3.xpose.msk.msra.mxu1 %vm187_vm2, %v4784_v34 }
 0x8e6   :  { %4078 = vmatprep.subr.mxu1 %v4321_v6 }
 0x8ea   :  { %v2055_v35 = vpop.permute.xlu1 %2054 }
 0x8eb   :  { %4084 = vmatpush3.xpose.msk.msra.mxu0 %vm187_vm2, %v2055_v35 }
 0x8ec   :  { %4093 = vmatprep.subr.mxu0 %v4321_v6 }
 0x8ee   :  { %v2228_v41 = vpop.permute.xlu1 %2227 }
 0x9a4   :  { %v4061_v36 = vpop.f32.mrf.mxu1 }
 0x9a5   :  { %v1785_v40 = vadd.f32 %v4061_v36, %v3785_v37 }
 0x9a6   :  { %v1779_v38 = vpop.f32.mrf.mxu1 }
 0x9a7   :  { %v1780_v39 = vadd.f32 %v3785_v37, %v1779_v38 }
 0x9a9   :  { %2225 = vrot.lane.b32.xlu1 %v1780_v39, %s4328_s0  ;;  %2052 = vrot.lane.b32.xlu0 %v1780_v39, %s4326_s5 }
 0x9aa   :  { %4076 = vmatmul.mubr.msk.f32.vlgmr.msra.gmra.mxu1 %vm187_vm2, %v1780_v39 }
 0x9ab   :  { %4080 = vmatprep.mubr.msk.f32.mxu1 %vm4322_vm1, %v4321_v6 }
 0x9ad   :  { %2398 = vrot.lane.b32.xlu1 %v1780_v39, %s4330_s11  ;;  %2400 = vrot.lane.b32.xlu0 %v4784_v34, %s4330_s11 }
 0x9b1   :  { %2743 = vrot.lane.b32.xlu1 %v1785_v40, %s4326_s5  ;;  %2745 = vrot.lane.b32.xlu0 %v4782_v32, %s4326_s5 }
 0x9b5   :  { %2916 = vrot.lane.b32.xlu1 %v1785_v40, %s4328_s0  ;;  %2918 = vrot.lane.b32.xlu0 %v4782_v32, %s4328_s0 }
 0x9b9   :  { %3089 = vrot.lane.b32.xlu1 %v1785_v40, %s4330_s11  ;;  %3091 = vrot.lane.b32.xlu0 %v4782_v32, %s4330_s11  ;;  %s5139_s11 = sld [smem:[#allocation9_spill]] }
 0x9bd   :  { %2144 = vrot.lane.b32.xlu1 %v4784_v34, %s5137_s1  ;;  %1975 = vrot.lane.b32.xlu0 %v4784_v34, %s5138_s12 }
 0x9bf   :  { %v3793_v54 = vld [vmem:[%s5139_s11] ss:$0 sm:$0xff]  ;;  %v3806_v10 = vld [vmem:[%s5139_s11 + $0x1] ss:$0 sm:$0xff] }
 0xa1b   :  { %v2226_v42 = vpop.permute.xlu1 %2225  ;;  %v2053_v43 = vpop.permute.xlu0 %2052 }
 0xa1c   :  { %4086 = vmatmul.mubr.msk.f32.vlgmr.msra.gmra.mxu0 %vm187_vm2, %v2053_v43 }
 0xa1d   :  { %4094 = vmatpush3.xpose.msk.msra.mxu0 %vm187_vm2, %v2228_v41  ;;  %4095 = vmatprep.mubr.msk.f32.mxu0 %vm4322_vm1, %v4321_v6 }
 0xa1e   :  { %4103 = vmatprep.subr.mxu0 %v4321_v6 }
 0xa1f   :  { %v2401_v44 = vpop.permute.xlu0 %2400  ;;  %v2399_v45 = vpop.permute.xlu1 %2398 }
 0xa20   :  { %4096 = vmatmul.mubr.msk.f32.vlgmr.msra.gmra.mxu0 %vm187_vm2, %v2226_v42 }
 0xa21   :  { %4104 = vmatpush3.xpose.msk.msra.mxu0 %vm187_vm2, %v2401_v44  ;;  %4105 = vmatprep.mubr.msk.f32.mxu0 %vm4322_vm1, %v4321_v6 }
 0xa22   :  { %4113 = vmatprep.subr.mxu0 %v4321_v6 }
 0xa23   :  { %v2746_v46 = vpop.permute.xlu0 %2745  ;;  %v2744_v47 = vpop.permute.xlu1 %2743 }
 0xa24   :  { %4106 = vmatmul.mubr.msk.f32.vlgmr.msra.gmra.mxu0 %vm187_vm2, %v2399_v45 }
 0xa25   :  { %4114 = vmatpush3.xpose.msk.msra.mxu0 %vm187_vm2, %v4782_v32  ;;  %4115 = vmatprep.mubr.msk.f32.mxu0 %vm4322_vm1, %v4321_v6 }
 0xa26   :  { %4123 = vmatprep.subr.mxu0 %v4321_v6 }
 0xa27   :  { %v2919_v48 = vpop.permute.xlu0 %2918  ;;  %v2917_v50 = vpop.permute.xlu1 %2916 }
 0xa28   :  { %4116 = vmatmul.mubr.msk.f32.vlgmr.msra.gmra.mxu0 %vm187_vm2, %v1785_v40 }
 0xa29   :  { %4124 = vmatpush3.xpose.msk.msra.mxu0 %vm187_vm2, %v2746_v46  ;;  %4125 = vmatprep.mubr.msk.f32.mxu0 %vm4322_vm1, %v4321_v6 }
 0xa2a   :  { %4133 = vmatprep.subr.mxu0 %v4321_v6 }
 0xa2b   :  { %v3092_v49 = vpop.permute.xlu0 %3091  ;;  %v3090_v52 = vpop.permute.xlu1 %3089 }
 0xa2c   :  { %4126 = vmatmul.mubr.msk.f32.vlgmr.msra.gmra.mxu0 %vm187_vm2, %v2744_v47 }
 0xa2d   :  { %4134 = vmatpush3.xpose.msk.msra.mxu0 %vm187_vm2, %v2919_v48  ;;  %4135 = vmatprep.mubr.msk.f32.mxu0 %vm4322_vm1, %v4321_v6 }
 0xa2e   :  { %4143 = vmatprep.subr.mxu0 %v4321_v6 }
 0xa2f   :  { %v1976_v51 = vpop.permute.xlu0 %1975  ;;  %v2145_v41 = vpop.permute.xlu1 %2144 }
 0xa30   :  { %4079 = vmatpush3.msra.mxu1 %v1976_v51  ;;  %4136 = vmatmul.mubr.msk.f32.vlgmr.msra.gmra.mxu0 %vm187_vm2, %v2917_v50 }
 0xa31   :  { %4144 = vmatpush3.xpose.msk.msra.mxu0 %vm187_vm2, %v3092_v49  ;;  %4145 = vmatprep.mubr.msk.f32.mxu0 %vm4322_vm1, %v4321_v6 }
 0xa32   :  { %4088 = vmatprep.subr.mxu1 %v4321_v6 }
 0xa34   :  { %4146 = vmatmul.mubr.msk.f32.vlgmr.msra.gmra.mxu0 %vm187_vm2, %v3090_v52 }
 0xa6a   :  { %v1953_v53 = vpop.f32.mrf.mxu1 }
 0xa6b   :  { %v1957_v55 = vmul.f32 0.35355338, %v1953_v53 }
 0xa6c   :  { %v4077_v56 = vpop.f32.mrf.mxu1 }
 0xa6d   :  { %v1962_v57 = vadd.f32 %v3793_v54, %v1957_v55 }
 0xa6f   :  { %v1963_v58 = vsel %vm187_vm2, %v1962_v57, -inf }
 0xa70   :  { %1964 = vmax.xlane.f32.xlu0 %v1963_v58 }
 0xadc   :  { %v2126_v59 = vpop.f32.mrf.mxu0 }
 0xadd   :  { %v2130_v60 = vmul.f32 0.35355338, %v2126_v59 }
 0xade   :  { %v4087_v61 = vpop.f32.mrf.mxu0 }
 0xadf   :  { %v2131_v62 = vadd.f32 %v3793_v54, %v2130_v60 }
 0xae0   :  { %v2299_v63 = vpop.f32.mrf.mxu0 }
 0xae1   :  { %v2303_v11 = vmul.f32 0.35355338, %v2299_v63  ;;  %v2132_v0 = vsel %vm187_vm2, %v2131_v62, -inf }
 0xae2   :  { %2133 = vmax.xlane.f32.xlu1 %v2132_v0  ;;  %v4097_v5 = vpop.f32.mrf.mxu0 }
 0xae3   :  { %v2304_v2 = vadd.f32 %v3793_v54, %v2303_v11 }
 0xae4   :  { %v2472_v9 = vpop.f32.mrf.mxu0 }
 0xae5   :  { %v2476_v1 = vmul.f32 0.35355338, %v2472_v9  ;;  %v2305_v3 = vsel %vm187_vm2, %v2304_v2, -inf }
 0xae6   :  { %v4107_v4 = vpop.f32.mrf.mxu0  ;;  %2306 = vmax.xlane.f32.xlu0 %v2305_v3 }
 0xae7   :  { %v2477_v7 = vadd.f32 %v3793_v54, %v2476_v1 }
 0xae8   :  { %v2644_v8 = vpop.f32.mrf.mxu0 }
 0xae9   :  { %v2648_v12 = vmul.f32 0.35355338, %v2644_v8  ;;  %v2478_v13 = vsel %vm187_vm2, %v2477_v7, -inf }
 0xaea   :  { %v4117_v14 = vpop.f32.mrf.mxu0  ;;  %2479 = vmax.xlane.f32.xlu0 %v2478_v13 }
 0xaeb   :  { %v2653_v15 = vadd.f32 %v3806_v10, %v2648_v12 }
 0xaec   :  { %v2817_v16 = vpop.f32.mrf.mxu0 }
 0xaed   :  { %v2821_v17 = vmul.f32 0.35355338, %v2817_v16  ;;  %v2654_v18 = vsel %vm187_vm2, %v2653_v15, -inf }
 0xaee   :  { %2655 = vmax.xlane.f32.xlu1 %v2654_v18  ;;  %v4127_v20 = vpop.f32.mrf.mxu0 }
 0xaef   :  { %v2822_v21 = vadd.f32 %v3806_v10, %v2821_v17 }
 0xaf0   :  { %v2990_v22 = vpop.f32.mrf.mxu0 }
 0xaf1   :  { %v2994_v23 = vmul.f32 0.35355338, %v2990_v22  ;;  %v2823_v19 = vsel %vm187_vm2, %v2822_v21, -inf }
 0xaf2   :  { %v4137_v24 = vpop.f32.mrf.mxu0  ;;  %2824 = vmax.xlane.f32.xlu0 %v2823_v19 }
 0xaf3   :  { %v2995_v25 = vadd.f32 %v3806_v10, %v2994_v23 }
 0xaf4   :  { %v3163_v26 = vpop.f32.mrf.mxu0 }
 0xaf5   :  { %v3167_v28 = vmul.f32 0.35355338, %v3163_v26  ;;  %v2996_v30 = vsel %vm187_vm2, %v2995_v25, -inf }
 0xaf6   :  { %2997 = vmax.xlane.f32.xlu1 %v2996_v30  ;;  %v4147_v31 = vpop.f32.mrf.mxu0 }
 0xaf7   :  { %v3168_v33 = vadd.f32 %v3806_v10, %v3167_v28 }
 0xaf9   :  { %v3169_v35 = vsel %vm187_vm2, %v3168_v33, -inf  ;;  %v1965_v36 = vpop.xlane.xlu0 %1964 }
 0xafa   :  { %3170 = vmax.xlane.f32.xlu0 %v3169_v35  ;;  %v1966_v37 = vsub.f32 %v1962_v57, %v1965_v36 }
 0xafc   :  { %v1967_v38 = vmul.f32 1.442695, %v1966_v37 }
 0xafe   :  { %4259 = vpow2.f32 %v1967_v38 }
 0xb07   :  { %2490 = vrot.lane.b32.xlu1 %v4784_v34, %s5140_s9 }
 0xb0b   :  { %v4260_v39 = vpop.eup %4259 }
 0xb0c   :  { %v1969_v40 = vsel %vm187_vm2, %v4260_v39, 0.0 }
 0xb10   :  { %2317 = vrot.lane.b32.xlu0 %v4784_v34, %s5141_s28 }
 0xb2b   :  { %1970 = vadd.xlane.f32.xlu1 %v1969_v40 }
 0xb6b   :  { %v2134_v42 = vpop.xlane.xlu1 %2133 }
 0xb6c   :  { %v2135_v43 = vsub.f32 %v2131_v62, %v2134_v42 }
 0xb6e   :  { %v2136_v44 = vmul.f32 1.442695, %v2135_v43 }
 0xb6f   :  { %v2307_v45 = vpop.xlane.xlu0 %2306 }
 0xb70   :  { %4261 = vpow2.f32 %v2136_v44  ;;  %v2308_v46 = vsub.f32 %v2304_v2, %v2307_v45 }
 0xb72   :  { %v2309_v47 = vmul.f32 1.442695, %v2308_v46 }
 0xb73   :  { %v2480_v48 = vpop.xlane.xlu0 %2479 }
 0xb74   :  { %4263 = vpow2.f32 %v2309_v47  ;;  %v2481_v49 = vsub.f32 %v2477_v7, %v2480_v48 }
 0xb76   :  { %v2482_v50 = vmul.f32 1.442695, %v2481_v49 }
 0xb77   :  { %v2656_v56 = vpop.xlane.xlu1 %2655 }
 0xb78   :  { %4265 = vpow2.f32 %v2482_v50  ;;  %v2657_v57 = vsub.f32 %v2653_v15, %v2656_v56  ;;  %v3265_v56 = vld [vmem:[%s5079_s14 + $0x8] sm:$0xff] }
 0xb7a   :  { %v2658_v61 = vmul.f32 1.442695, %v2657_v57 }
 0xb7b   :  { %v2825_v58 = vpop.xlane.xlu0 %2824 }
 0xb7c   :  { %v2826_v60 = vsub.f32 %v2822_v21, %v2825_v58  ;;  %4267 = vpow2.f32 %v2658_v61  ;;  %v3264_v58 = vld [vmem:[%s5079_s14] sm:$0xff] }
 0xb7d   :  { %v4262_v34 = vpop.eup %4261 }
 0xb7e   :  { %v2138_v51 = vsel %vm187_vm2, %v4262_v34, 0.0  ;;  %v2827_v11 = vmul.f32 1.442695, %v2826_v60 }
 0xb7f   :  { %2139 = vadd.xlane.f32.xlu0 %v2138_v51  ;;  %v2998_v59 = vpop.xlane.xlu1 %2997 }
 0xb80   :  { %v2999_v62 = vsub.f32 %v2995_v25, %v2998_v59  ;;  %4269 = vpow2.f32 %v2827_v11 }
 0xb81   :  { %v4871_v52 = vpop.eup %4263 }
 0xb82   :  { %v2311_v53 = vsel %vm187_vm2, %v4871_v52, 0.0  ;;  %v3000_v0 = vmul.f32 1.442695, %v2999_v62 }
 0xb83   :  { %2312 = vadd.xlane.f32.xlu1 %v2311_v53  ;;  %v3171_v63 = vpop.xlane.xlu0 %3170  ;;  %v2491_v9 = vpop.permute.xlu1 %2490 }
 0xb84   :  { %v3172_v5 = vsub.f32 %v3168_v33, %v3171_v63  ;;  %4271 = vpow2.f32 %v3000_v0 }
 0xb85   :  { %v4875_v54 = vpop.eup %4265 }
 0xb86   :  { %v2484_v55 = vsel %vm187_vm2, %v4875_v54, 0.0  ;;  %v3173_v2 = vmul.f32 1.442695, %v3172_v5 }
 0xb87   :  { %2485 = vadd.xlane.f32.xlu0 %v2484_v55  ;;  %v2318_v17 = vpop.permute.xlu0 %2317 }
 0xb88   :  { %4273 = vpow2.f32 %v3173_v2 }
 0xb89   :  { %v4268_v1 = vpop.eup %4267 }
 0xb8a   :  { %v2660_v7 = vsel %vm187_vm2, %v4268_v1, 0.0 }
 0xb8d   :  { %v4883_v4 = vpop.eup %4269 }
 0xb8e   :  { %v2829_v12 = vsel %vm187_vm2, %v4883_v4, 0.0 }
 0xb91   :  { %v4886_v8 = vpop.eup %4271 }
 0xb92   :  { %v3002_v10 = vsel %vm187_vm2, %v4886_v8, 0.0 }
 0xb94   :  { %2835 = vrot.lane.b32.xlu1 %v4782_v32, %s5137_s1 }
 0xb95   :  { %v4892_v13 = vpop.eup %4273 }
 0xb96   :  { %v3175_v14 = vsel %vm187_vm2, %v4892_v13, 0.0 }
 0xb9d   :  { %2666 = vrot.lane.b32.xlu0 %v4782_v32, %s5138_s12 }
 0xbb4   :  { %v1971_v3 = vpop.xlane.xlu1 %1970 }
 0xbb5   :  { %4275 = vrcp.f32 %v1971_v3 }
 0xbb8   :  { %2661 = vadd.xlane.f32.xlu1 %v2660_v7  ;;  %v3817_v7 = vld [vmem:[%s5080_s15] ss:$0 sm:$0xff]  ;;  %s4337_s15 = smov [#allocation3]  }
 0xbb9   :  { %s3740_s11 = sshll.u32 %s4337_s15, 4  ;;  %s3741_s11 = int_to_ptr.vmem [resolvable:$true] %s3740_s11 }
 0xbba   :  { %s4299_s8 = scalar_lea.vmem %s3741_s11, 1024  ;;  %p4304_p1 = scmp.lt.s32.totalorder %s3741_s11, %s3741_s11 }
 0xbbb   :  { %p4300_p0 = scmp.ne.s32.totalorder %s3741_s11, %s4299_s8  ;;  %p4305_p2 = scmp.lt.s32.totalorder %s4299_s8, %s4299_s8 }
 0xbbc   :  { %3003 = vadd.xlane.f32.xlu1 %v3002_v10  ;;  %2830 = vadd.xlane.f32.xlu0 %v2829_v12 }
 0xbbd   :  { %p4306_p3 = por %p4305_p2, %p4304_p1 }
 0xbbf   :  { %p4307_p4 = pnand %p4306_p3, %p4300_p0 }
 0xbc0   :  { %3176 = vadd.xlane.f32.xlu1 %v3175_v14 }
 0xbc2   :  { %v4276_v15 = vpop.eup %4275 }
 0xbc3   :  { %v1973_v16 = vmul.f32 %v4276_v15, %v4260_v39 }
 0xbc5   :  { %1974 = vst.msk [vmem:[#allocation3] sm:$0xff] %vm187_vm2, %v1973_v16  ;;  %4081 = vmatmul.mubr.msk.f32.vlgmr.msra.gmra.mxu1 %vm187_vm2, %v1973_v16 }
 0xbc6   :  { %4089 = vmatpush3.msra.mxu1 %v2145_v41  ;;  %4090 = vmatprep.mubr.msk.f32.mxu1 %vm4322_vm1, %v4321_v6 }
 0xbc7   :  { %4098 = vmatprep.subr.mxu1 %v4321_v6 }
 0xbd1   :  { %3181 = vrot.lane.b32.xlu1 %v4782_v32, %s5140_s9 }
 0xbd2   :  { %3008 = vrot.lane.b32.xlu0 %v4782_v32, %s5141_s28 }
 0xc08   :  { %v2140_v18 = vpop.xlane.xlu0 %2139 }
 0xc09   :  { %4277 = vrcp.f32 %v2140_v18 }
 0xc0c   :  { %v2313_v20 = vpop.xlane.xlu1 %2312 }
 0xc0d   :  { %4279 = vrcp.f32 %v2313_v20 }
 0xc10   :  { %v2486_v21 = vpop.xlane.xlu0 %2485  ;;  %v2836_v28 = vpop.permute.xlu1 %2835 }
 0xc11   :  { %4281 = vrcp.f32 %v2486_v21 }
 0xc14   :  { %v2667_v26 = vpop.permute.xlu0 %2666 }
 0xc16   :  { %v4278_v22 = vpop.eup %4277 }
 0xc17   :  { %v2142_v23 = vmul.f32 %v4278_v22, %v4262_v34 }
 0xc19   :  { %2143 = vst.msk [vmem:[#allocation3 + $0x8] sm:$0xff] %vm187_vm2, %v2142_v23  ;;  %4091 = vmatmul.mubr.msk.f32.vlgmr.msra.gmra.mxu1 %vm187_vm2, %v2142_v23 }
 0xc1a   :  { %v4280_v19 = vpop.eup %4279  ;;  %4099 = vmatpush3.msra.mxu1 %v2318_v17  ;;  %4100 = vmatprep.mubr.msk.f32.mxu1 %vm4322_vm1, %v4321_v6 }
 0xc1b   :  { %4108 = vmatprep.subr.mxu1 %v4321_v6  ;;  %v2315_v32 = vmul.f32 %v4280_v19, %v4871_v52 }
 0xc1d   :  { %2316 = vst.msk [vmem:[#allocation3 + $0x10] sm:$0xff] %vm187_vm2, %v2315_v32  ;;  %4101 = vmatmul.mubr.msk.f32.vlgmr.msra.gmra.mxu1 %vm187_vm2, %v2315_v32 }
 0xc1e   :  { %v4282_v24 = vpop.eup %4281  ;;  %4109 = vmatpush3.msra.mxu1 %v2491_v9  ;;  %4110 = vmatprep.mubr.msk.f32.mxu1 %vm4322_vm1, %v4321_v6 }
 0xc1f   :  { %4118 = vmatprep.subr.mxu1 %v4321_v6  ;;  %v2488_v25 = vmul.f32 %v4282_v24, %v4875_v54  ;;  %v3266_v54 = vld [vmem:[%s5079_s14 + $0x10] sm:$0xff] }
 0xc21   :  { %2489 = vst.msk [vmem:[#allocation3 + $0x18] sm:$0xff] %vm187_vm2, %v2488_v25  ;;  %4111 = vmatmul.mubr.msk.f32.vlgmr.msra.gmra.mxu1 %vm187_vm2, %v2488_v25 }
 0xc22   :  { %4119 = vmatpush3.msra.mxu1 %v2667_v26  ;;  %4120 = vmatprep.mubr.msk.f32.mxu1 %vm4322_vm1, %v4321_v6  ;;  %v3404_v26 = vld [vmem:[%s5083_s18 + $0x10] sm:$0xff] }
 0xc23   :  { %4128 = vmatprep.subr.mxu1 %v4321_v6 }
 0xc41   :  { %v2662_v30 = vpop.xlane.xlu1 %2661 }
 0xc42   :  { %4283 = vrcp.f32 %v2662_v30  ;;  %v3402_v30 = vld [vmem:[%s5083_s18] sm:$0xff] }
 0xc45   :  { %v3004_v31 = vpop.xlane.xlu1 %3003  ;;  %v2831_v33 = vpop.xlane.xlu0 %2830 }
 0xc46   :  { %4285 = vrcp.f32 %v3004_v31  ;;  %v3503_v31 = vld [vmem:[%s5085_s20 + $0x38] sm:$0xff] }
 0xc47   :  { %4287 = vrcp.f32 %v2831_v33  ;;  %v3502_v33 = vld [vmem:[%s5085_s20 + $0x30] sm:$0xff] }
 0xc49   :  { %v3177_v35 = vpop.xlane.xlu1 %3176  ;;  %v3009_v43 = vpop.permute.xlu0 %3008 }
 0xc4a   :  { %4289 = vrcp.f32 %v3177_v35  ;;  %v3501_v35 = vld [vmem:[%s5085_s20 + $0x28] sm:$0xff] }
 0xc4d   :  { %v3182_v45 = vpop.permute.xlu1 %3181 }
 0xc4f   :  { %v4284_v36 = vpop.eup %4283 }
 0xc50   :  { %v2664_v37 = vmul.f32 %v4284_v36, %v4268_v1  ;;  %v3500_v36 = vld [vmem:[%s5085_s20 + $0x20] sm:$0xff] }
 0xc52   :  { %2665 = vst.msk [vmem:[#allocation3 + $0x20] sm:$0xff] %vm187_vm2, %v2664_v37  ;;  %4121 = vmatmul.mubr.msk.f32.vlgmr.msra.gmra.mxu1 %vm187_vm2, %v2664_v37 }
 0xc53   :  { %v4286_v38 = vpop.eup %4285  ;;  %4129 = vmatpush3.msra.mxu1 %v2836_v28  ;;  %4130 = vmatprep.mubr.msk.f32.mxu1 %vm4322_vm1, %v4321_v6  ;;  %v3403_v28 = vld [vmem:[%s5083_s18 + $0x8] sm:$0xff] }
 0xc54   :  { %v4288_v39 = vpop.eup %4287  ;;  %4138 = vmatprep.subr.mxu1 %v4321_v6  ;;  %v3006_v40 = vmul.f32 %v4286_v38, %v4886_v8 }
 0xc55   :  { %v2833_v41 = vmul.f32 %v4288_v39, %v4883_v4 }
 0xc56   :  { %3007 = vst.msk [vmem:[#allocation3 + $0x30] sm:$0xff] %vm187_vm2, %v3006_v40 }
 0xc57   :  { %v4290_v42 = vpop.eup %4289  ;;  %2834 = vst.msk [vmem:[#allocation3 + $0x28] sm:$0xff] %vm187_vm2, %v2833_v41  ;;  %4131 = vmatmul.mubr.msk.f32.vlgmr.msra.gmra.mxu1 %vm187_vm2, %v2833_v41 }
 0xc58   :  { %4139 = vmatpush3.msra.mxu1 %v3009_v43  ;;  %4140 = vmatprep.mubr.msk.f32.mxu1 %vm4322_vm1, %v4321_v6  ;;  %v3179_v44 = vmul.f32 %v4290_v42, %v4892_v13 }
 0xc59   :  { %4148 = vmatprep.subr.mxu1 %v4321_v6 }
 0xc5a   :  { %3180 = vst.msk [vmem:[#allocation3 + $0x38] sm:$0xff] %vm187_vm2, %v3179_v44 }
 0xc5b   :  { %4141 = vmatmul.mubr.msk.f32.vlgmr.msra.gmra.mxu1 %vm187_vm2, %v3006_v40 }
 0xc5c   :  { %4149 = vmatpush3.msra.mxu1 %v3182_v45  ;;  %4150 = vmatprep.mubr.msk.f32.mxu1 %vm4322_vm1, %v4321_v6  ;;  %v3267_v6 = vld [vmem:[%s5079_s14 + $0x18] sm:$0xff] }
 0xc5d   :  { %4153 = vmatprep.subr.mxu0 %v3267_v6 }
 0xc5e   :  { %4154 = vmatpush3.msra.mxu0 %v3267_v6  ;;  %v3497_v6 = vld [vmem:[%s5085_s20 + $0x8] sm:$0xff] }
 0xc5f   :  { %4151 = vmatmul.mubr.msk.f32.vlgmr.msra.gmra.mxu1 %vm187_vm2, %v3179_v44  ;;  %4155 = vmatprep.subr.mxu0 %v3266_v54  ;;  %v3820_v44 = vld [vmem:[%s5081_s16] ss:$0 sm:$0xff] }
 0xc60   :  { %4156 = vmatpush3.msra.mxu0 %v3266_v54  ;;  %v3496_v54 = vld [vmem:[%s5085_s20] sm:$0xff] }
 0xc61   :  { %4157 = vmatprep.subr.mxu0 %v3265_v56 }
 0xc62   :  { %4158 = vmatpush3.msra.mxu0 %v3265_v56 }
 0xc63   :  { %4159 = vmatprep.subr.mxu0 %v3264_v58 }
 0xc64   :  { %4160 = vmatpush3.msra.mxu0 %v3264_v58 }
 0xc65   :  { %4175 = vmatprep.subr.mxu0 %v3503_v31 }
 0xc85   :  { %v2047_v46 = vpop.f32.mrf.mxu1 }
 0xc86   :  { %2051 = vst.msk [vmem:[#allocation2] sm:$0xff] %vm187_vm2, %v2047_v46  ;;  %v3821_v46 = vld [vmem:[%s5082_s17] ss:$0 sm:$0xff] }
 0xc87   :  { %v4082_v47 = vpop.f32.mrf.mxu1 }
 0xcd9   :  { %v2216_v48 = vpop.f32.mrf.mxu1 }
 0xcda   :  { %2221 = vrot.lane.b32.xlu0 %v2216_v48, %s5142_s2 }
 0xcdb   :  { %v4092_v49 = vpop.f32.mrf.mxu1 }
 0xcdd   :  { %v2389_v50 = vpop.f32.mrf.mxu1 }
 0xcde   :  { %2394 = vrot.lane.b32.xlu1 %v2389_v50, %s5143_s6 }
 0xcdf   :  { %v4102_v34 = vpop.f32.mrf.mxu1 }
 0xce1   :  { %v2562_v51 = vpop.f32.mrf.mxu1 }
 0xce2   :  { %2567 = vrot.lane.b32.xlu1 %v2562_v51, %s5144_s3 }
 0xce3   :  { %v4112_v52 = vpop.f32.mrf.mxu1 }
 0xce4   :  { %v3499_v52 = vld [vmem:[%s5085_s20 + $0x18] sm:$0xff] }
 0xd12   :  { %v2738_v53 = vpop.f32.mrf.mxu1 }
 0xd13   :  { %2742 = vst.msk [vmem:[#allocation2 + $0x8] sm:$0xff] %vm187_vm2, %v2738_v53  ;;  %v3498_v53 = vld [vmem:[%s5085_s20 + $0x10] sm:$0xff] }
 0xd14   :  { %v4122_v55 = vpop.f32.mrf.mxu1 }
 0xd15   :  { %v3822_v55 = vld [vmem:[%s5084_s19] ss:$0 sm:$0xff] }
 0xd17   :  { %v2907_v57 = vpop.f32.mrf.mxu1 }
 0xd18   :  { %2912 = vrot.lane.b32.xlu0 %v2907_v57, %s5142_s2 }
 0xd19   :  { %v4132_v59 = vpop.f32.mrf.mxu1 }
 0xd1b   :  { %v3080_v60 = vpop.f32.mrf.mxu1 }
 0xd1c   :  { %3085 = vrot.lane.b32.xlu0 %v3080_v60, %s5143_s6 }
 0xd1d   :  { %v4142_v61 = vpop.f32.mrf.mxu1 }
 0xd1f   :  { %v3253_v62 = vpop.f32.mrf.mxu1 }
 0xd20   :  { %3258 = vrot.lane.b32.xlu1 %v3253_v62, %s5144_s3  ;;  %v3825_v62 = vld [vmem:[%s5086_s21] ss:$0 sm:$0xff] }
 0xd21   :  { %v4152_v63 = vpop.f32.mrf.mxu1 }
 0xd4c   :  { %v2222_v11 = vpop.permute.xlu0 %2221 }
 0xd4d   :  { %2224 = vst.msk [vmem:[#allocation2] sm:$0xff] %vm523_vm3, %v2222_v11 }
 0xd50   :  { %v2395_v0 = vpop.permute.xlu1 %2394 }
 0xd51   :  { %2397 = vst.msk [vmem:[#allocation2] sm:$0xff] %vm696_vm4, %v2395_v0 }
 0xd54   :  { %v2568_v5 = vpop.permute.xlu1 %2567 }
 0xd55   :  { %2570 = vst.msk [vmem:[#allocation2] sm:$0xff] %vm869_vm5, %v2568_v5 }
 0xd5c   :  { %v3262_v2 = vld [vmem:[#allocation2] sm:$0xff] }
 0xd5d   :  { %4161 = vmatprep.mubr.msk.f32.mxu0 %vm101_vm0, %v3262_v2 }
 0xd8a   :  { %v2913_v9 = vpop.permute.xlu0 %2912 }
 0xd8b   :  { %2915 = vst.msk [vmem:[#allocation2 + $0x8] sm:$0xff] %vm523_vm3, %v2913_v9 }
 0xd8e   :  { %v3086_v1 = vpop.permute.xlu0 %3085 }
 0xd8f   :  { %3088 = vst.msk [vmem:[#allocation2 + $0x8] sm:$0xff] %vm696_vm4, %v3086_v1 }
 0xd92   :  { %v3259_v3 = vpop.permute.xlu1 %3258 }
 0xd93   :  { %3261 = vst.msk [vmem:[#allocation2 + $0x8] sm:$0xff] %vm869_vm5, %v3259_v3 }
 0xd9a   :  { %v3263_v4 = vld [vmem:[#allocation2 + $0x8] sm:$0xff] }
 0xd9b   :  { %4162 = vmatmul.mubr.msk.f32.vlgmr.msra.gmra.mxu0 %vm101_vm0, %v3263_v4 }
 0xd9c   :  { %4176 = vmatpush3.msra.mxu0 %v3503_v31 }
 0xd9d   :  { %4177 = vmatprep.subr.mxu0 %v3502_v33 }
 0xd9e   :  { %4178 = vmatpush3.msra.mxu0 %v3502_v33 }
 0xd9f   :  { %4179 = vmatprep.subr.mxu0 %v3501_v35 }
 0xda0   :  { %4180 = vmatpush3.msra.mxu0 %v3501_v35  ;;  %v3829_v35 = vld [vmem:[%s5088_s23] ss:$0 sm:$0xff] }
 0xda1   :  { %4181 = vmatprep.subr.mxu0 %v3500_v36 }
 0xda2   :  { %4182 = vmatpush3.msra.mxu0 %v3500_v36 }
 0xda3   :  { %4183 = vmatprep.subr.mxu0 %v3499_v52 }
 0xda4   :  { %4184 = vmatpush3.msra.mxu0 %v3499_v52 }
 0xda5   :  { %4185 = vmatprep.subr.mxu0 %v3498_v53 }
 0xda6   :  { %4186 = vmatpush3.msra.mxu0 %v3498_v53 }
 0xda7   :  { %4187 = vmatprep.subr.mxu0 %v3497_v6 }
 0xda8   :  { %4188 = vmatpush3.msra.mxu0 %v3497_v6 }
 0xda9   :  { %4189 = vmatprep.subr.mxu0 %v3496_v54 }
 0xdaa   :  { %4190 = vmatpush3.msra.mxu0 %v3496_v54 }
 0xe5b   :  { %v4163_v8 = vpop.f32.mrf.mxu0 }
 0xe5c   :  { %v3353_v10 = vadd.f32 %v4163_v8, %v3817_v7 }
 0xe5d   :  { %v3347_v12 = vpop.f32.mrf.mxu0 }
 0xe5e   :  { %v3357_v13 = vadd.f32 %v3353_v10, %v4773_v29  ;;  %v3348_v14 = vadd.f32 %v3817_v7, %v3347_v12 }
 0xe60   :  { %v3363_v15 = vsel %vm101_vm0, %v3357_v13, 0.0  ;;  %v3356_v16 = vadd.f32 %v3348_v14, %v4769_v27  ;;  %v3405_v27 = vld [vmem:[%s5083_s18 + $0x18] sm:$0xff] }
 0xe61   :  { %3364 = vadd.xlane.f32.xlu1 %v3363_v15  ;;  %4164 = vmatprep.subr.mxu1 %v3405_v27 }
 0xe62   :  { %v3360_v17 = vsel %vm101_vm0, %v3356_v16, 0.0  ;;  %4165 = vmatpush3.msra.mxu1 %v3405_v27 }
 0xe63   :  { %3361 = vadd.xlane.f32.xlu0 %v3360_v17  ;;  %4166 = vmatprep.subr.mxu1 %v3404_v26 }
 0xe64   :  { %4167 = vmatpush3.msra.mxu1 %v3404_v26  ;;  %v3828_v26 = vld [vmem:[%s5087_s22] ss:$0 sm:$0xff] }
 0xe65   :  { %4168 = vmatprep.subr.mxu1 %v3403_v28 }
 0xe66   :  { %4169 = vmatpush3.msra.mxu1 %v3403_v28 }
 0xe67   :  { %4170 = vmatprep.subr.mxu1 %v3402_v30 }
 0xe68   :  { %4171 = vmatpush3.msra.mxu1 %v3402_v30 }
 0xeea   :  { %v3365_v18 = vpop.xlane.xlu1 %3364 }
 0xeeb   :  { %v3367_v20 = vmul.f32 0.03125, %v3365_v18  ;;  %v3642_v18 = vld [vmem:[%s5089_s24 + $0x18] sm:$0xff] }
 0xeec   :  { %v3362_v21 = vpop.xlane.xlu0 %3361  ;;  %4194 = vmatprep.subr.mxu1 %v3642_v18 }
 0xeed   :  { %v3366_v22 = vmul.f32 0.03125, %v3362_v21  ;;  %v3369_v23 = vsub.f32 %v3357_v13, %v3367_v20  ;;  %v3641_v20 = vld [vmem:[%s5089_s24 + $0x10] sm:$0xff]  ;;  %v3640_v21 = vld [vmem:[%s5089_s24 + $0x8] sm:$0xff] }
 0xeef   :  { %v3368_v19 = vsub.f32 %v3356_v16, %v3366_v22  ;;  %v3371_v25 = vmul.f32 %v3369_v23, %v3369_v23  ;;  %v3639_v22 = vld [vmem:[%s5089_s24] sm:$0xff] }
 0xef1   :  { %v3370_v32 = vmul.f32 %v3368_v19, %v3368_v19  ;;  %v3375_v29 = vsel %vm101_vm0, %v3371_v25, 0.0 }
 0xef3   :  { %v3372_v24 = vsel %vm101_vm0, %v3370_v32, 0.0 }
 0xef4   :  { %3373 = vadd.xlane.f32.xlu0 %v3372_v24 }
 0xef8   :  { %3376 = vadd.xlane.f32.xlu0 %v3375_v29 }
 0xf7d   :  { %v3374_v37 = vpop.xlane.xlu0 %3373 }
 0xf7e   :  { %v3378_v38 = vmul.f32 0.03125, %v3374_v37 }
 0xf80   :  { %v3380_v39 = vadd.f32 1e-05, %v3378_v38 }
 0xf81   :  { %v3377_v40 = vpop.xlane.xlu0 %3376 }
 0xf82   :  { %4291 = vrsqrt.f32 %v3380_v39  ;;  %v3379_v41 = vmul.f32 0.03125, %v3377_v40 }
 0xf84   :  { %v3381_v42 = vadd.f32 1e-05, %v3379_v41 }
 0xf86   :  { %4293 = vrsqrt.f32 %v3381_v42 }
 0xf8f   :  { %v4292_v43 = vpop.eup %4291 }
 0xf90   :  { %v3384_v45 = vmul.f32 %v4292_v43, %v3368_v19 }
 0xf92   :  { %v3392_v47 = vmul.f32 %v3820_v44, %v3384_v45 }
 0xf93   :  { %v4294_v48 = vpop.eup %4293 }
 0xf94   :  { %v3385_v49 = vmul.f32 %v4294_v48, %v3369_v23  ;;  %v3400_v50 = vadd.f32 %v3821_v46, %v3392_v47 }
 0xf96   :  { %v3393_v34 = vmul.f32 %v3820_v44, %v3385_v49  ;;  %4172 = vmatprep.mubr.msk.f32.mxu1 %vm101_vm0, %v3400_v50 }
 0xf98   :  { %v3401_v51 = vadd.f32 %v3821_v46, %v3393_v34 }
 0xf9a   :  { %4173 = vmatmul.mubr.msk.f32.vlgmr.msra.gmra.mxu1 %vm101_vm0, %v3401_v51 }
 0xf9b   :  { %4195 = vmatpush3.msra.mxu1 %v3642_v18 }
 0xf9c   :  { %4196 = vmatprep.subr.mxu1 %v3641_v20 }
 0xf9d   :  { %4197 = vmatpush3.msra.mxu1 %v3641_v20 }
 0xf9e   :  { %4198 = vmatprep.subr.mxu1 %v3640_v21 }
 0xf9f   :  { %4199 = vmatpush3.msra.mxu1 %v3640_v21 }
 0xfa0   :  { %4200 = vmatprep.subr.mxu1 %v3639_v22 }
 0xfa1   :  { %4201 = vmatpush3.msra.mxu1 %v3639_v22 }
0x105a   :  { %v4174_v56 = vpop.f32.mrf.mxu1 }
0x105b   :  { %v3491_v57 = vadd.f32 %v4174_v56, %v3822_v55 }
0x105c   :  { %v3485_v58 = vpop.f32.mrf.mxu1 }
0x105d   :  { %v3486_v59 = vadd.f32 %v3822_v55, %v3485_v58  ;;  %v3495_v61 = vmax.f32 %v3491_v57, 0.0 }
0x105f   :  { %v3494_v60 = vmax.f32 %v3486_v59, 0.0 }
0x1061   :  { %4191 = vmatprep.mubr.msk.f32.mxu0 %vm3511_vm6, %v3494_v60 }
0x1062   :  { %4192 = vmatmul.mubr.msk.f32.vlgmr.msra.gmra.mxu0 %vm3511_vm6, %v3495_v61 }
0x1122   :  { %v4193_v63 = vpop.f32.mrf.mxu0 }
0x1123   :  { %v3590_v11 = vadd.f32 %v4193_v63, %v3825_v62 }
0x1124   :  { %v3584_v0 = vpop.f32.mrf.mxu0 }
0x1125   :  { %v3585_v5 = vadd.f32 %v3825_v62, %v3584_v0  ;;  %v3594_v2 = vadd.f32 %v3590_v11, %v3401_v51 }
0x1127   :  { %v3593_v9 = vadd.f32 %v3585_v5, %v3400_v50  ;;  %v3600_v1 = vsel %vm101_vm0, %v3594_v2, 0.0 }
0x1128   :  { %3601 = vadd.xlane.f32.xlu0 %v3600_v1 }
0x1129   :  { %v3597_v3 = vsel %vm101_vm0, %v3593_v9, 0.0 }
0x112a   :  { %3598 = vadd.xlane.f32.xlu1 %v3597_v3 }
0x11b1   :  { %v3602_v4 = vpop.xlane.xlu0 %3601 }
0x11b2   :  { %v3604_v7 = vmul.f32 0.03125, %v3602_v4 }
0x11b3   :  { %v3599_v8 = vpop.xlane.xlu1 %3598 }
0x11b4   :  { %v3606_v10 = vsub.f32 %v3594_v2, %v3604_v7  ;;  %v3603_v12 = vmul.f32 0.03125, %v3599_v8 }
0x11b6   :  { %v3605_v13 = vsub.f32 %v3593_v9, %v3603_v12  ;;  %v3608_v14 = vmul.f32 %v3606_v10, %v3606_v10 }
0x11b8   :  { %v3612_v15 = vsel %vm101_vm0, %v3608_v14, 0.0  ;;  %v3607_v16 = vmul.f32 %v3605_v13, %v3605_v13 }
0x11b9   :  { %3613 = vadd.xlane.f32.xlu0 %v3612_v15 }
0x11ba   :  { %v3609_v17 = vsel %vm101_vm0, %v3607_v16, 0.0 }
0x11bb   :  { %3610 = vadd.xlane.f32.xlu1 %v3609_v17 }
0x1242   :  { %v3614_v23 = vpop.xlane.xlu0 %3613 }
0x1243   :  { %v3616_v19 = vmul.f32 0.03125, %v3614_v23 }
0x1244   :  { %v3611_v32 = vpop.xlane.xlu1 %3610 }
0x1245   :  { %v3618_v24 = vadd.f32 1e-05, %v3616_v19  ;;  %v3615_v25 = vmul.f32 0.03125, %v3611_v32 }
0x1247   :  { %4295 = vrsqrt.f32 %v3618_v24  ;;  %v3617_v29 = vadd.f32 1e-05, %v3615_v25 }
0x1249   :  { %4297 = vrsqrt.f32 %v3617_v29 }
0x1254   :  { %v4296_v27 = vpop.eup %4295 }
0x1255   :  { %v3622_v28 = vmul.f32 %v4296_v27, %v3606_v10 }
0x1256   :  { %v4298_v30 = vpop.eup %4297 }
0x1257   :  { %v3621_v31 = vmul.f32 %v4298_v30, %v3605_v13  ;;  %v3630_v33 = vmul.f32 %v3828_v26, %v3622_v28 }
0x1259   :  { %v3629_v36 = vmul.f32 %v3828_v26, %v3621_v31  ;;  %v3638_v38 = vadd.f32 %v3829_v35, %v3630_v33 }
0x125b   :  { %v3637_v37 = vadd.f32 %v3829_v35, %v3629_v36 }
0x125d   :  { %4202 = vmatprep.mubr.msk.f32.mxu1 %vm101_vm0, %v3637_v37 }
0x125e   :  { %4203 = vmatmul.mubr.msk.f32.vlgmr.msra.gmra.mxu1 %vm101_vm0, %v3638_v38 }
0x125f   :  { %4310 = shalt.err (!%p4307_p4)
}
0x1260   :  { %s4338_s22 = smov 128   ;;  %v3830_v39 = vld [vmem:[%s5090_s25] ss:$0 sm:$0xff] }
0x1261   :  { %3746 = dma.vmem_to_hbm [thread:$0]  %s3741_s11, 1024, %s5092_s27, [#allocation4], %s4338_s22, %s4338_s22, %s5142_s2  }
0x131e   :  { %v4204_v40 = vpop.f32.mrf.mxu1 }
0x131f   :  { %v3728_v41 = vadd.f32 %v4204_v40, %v3830_v39 }
0x1320   :  { %v3722_v42 = vpop.f32.mrf.mxu1 }
0x1321   :  { %3732 = vst [vmem:[%s5091_s26 + $0x8] sm:$0xff] %v3728_v41  ;;  %v3723_v43 = vadd.f32 %v3830_v39, %v3722_v42 }
0x1323   :  { %3731 = vst [vmem:[%s5091_s26] sm:$0xff] %v3723_v43 }
0x1324   :  { %4319 = dma.done.wait [#allocation4], 1024  }
0x1325   :  { %4320 = vsyncadd [#allocation4], 4294966272 }
0x1326   :  { %3752 = vsyncpa [#allocation4], 1 }

</bundles_post_ra>
